<compile_context>
chip_gen: v5e
topology: v5e:2x2
jax: 0.10.0
libtpu: 0.0.40
codegen_flags: <defaults>
</compile_context>

<pallas_src>
import functools

import jax
import jax.numpy as jnp
from jax import lax
from jax.experimental import pallas as pl
from jax.experimental.pallas import tpu as pltpu


def _round_up(x, m):
    return (x + m - 1) // m * m


def _pick_vmem_limit_bytes():
    """Per-generation scoped-VMEM limit with headroom (don't hardcode 32 MiB)."""
    cap = 64 * 1024 * 1024  # conservative fallback (v7x per-core physical VMEM)
    try:
        info = pltpu.get_tpu_info()
        cap = int(getattr(info, "vmem_capacity_bytes", cap) or cap)
    except Exception:
        pass
    return int(max(16 * 1024 * 1024, min(cap * 3 // 4, 100 * 1024 * 1024)))


# -----------------------------------------------------------------------------
# Kernel 1: LSTM recurrence (serial critical path, single program)
# -----------------------------------------------------------------------------
def _lstm_kernel(
    x_ref,      # (T*Bp, d_in)   time-major flattened [action|state], batch-padded
    wih_ref,    # (d_in, 4*H)    pre-transposed W_ih (natural gate width)
    whh_ref,    # (H, 4*H)       pre-transposed W_hh
    bg_ref,     # (1, 4*H)       fused b_ih + b_hh
    h0_ref,     # (Bp, H)
    c0_ref,     # (Bp, H)
    hs_ref,     # out: (T*Bp, H) hidden state at every step (feeds the MDN head)
    hn_ref,     # out: (Bp, H)
    cn_ref,     # out: (Bp, H)
    ig_ref,     # scratch: (T*Bp, 4*H) precomputed input-gate projections
    *, T, Bp, H,
):
    # 1) Input projection for the whole sequence: one big MXU matmul, hoisted
    #    off the serial recurrence.
    ig_ref[...] = (
        jnp.dot(x_ref[...], wih_ref[...], preferred_element_type=jnp.float32)
        + bg_ref[...]
    )

    # 2) Recurrence: only h @ W_hh + elementwise on the critical path.
    #    Gates stay packed at their natural 4*H width (no 128-lane gate pad).
    #    W_hh is read from VMEM inside the dot (not held live across the loop).
    def step(t, carry):
        h, c = carry
        r0 = pl.multiple_of(t * Bp, Bp)                       # sublane-aligned
        gates = ig_ref[pl.ds(r0, Bp), :] + jnp.dot(
            h, whh_ref[...], preferred_element_type=jnp.float32)   # (Bp, 4H)
        i_g = jax.nn.sigmoid(gates[:, 0 * H:1 * H])
        f_g = jax.nn.sigmoid(gates[:, 1 * H:2 * H])
        g_g = jnp.tanh(gates[:, 2 * H:3 * H])
        o_g = jax.nn.sigmoid(gates[:, 3 * H:4 * H])
        c = f_g * c + i_g * g_g
        h = o_g * jnp.tanh(c)
        hs_ref[pl.ds(r0, Bp), :] = h
        return h, c

    # Bounded unroll: keeps LLO scheduler visibility without blowing the vreg
    # file at long T.
    h, c = lax.fori_loop(0, T, step, (h0_ref[...], c0_ref[...]),
                         unroll=min(T, 8))
    hn_ref[...] = h
    cn_ref[...] = c


# -----------------------------------------------------------------------------
# Kernel 2: MDN head, row-tiled ("parallel" grid -> pipelined, both v7x TCs)
# -----------------------------------------------------------------------------
def _mdn_head_kernel(hs_ref, wh_ref, bh_ref, head_ref, *, GL, G, Kpad):
    # Fused head columns: [mu (GL) | sigma (GL) | pi (G) | pad].
    raw = (
        jnp.dot(hs_ref[...], wh_ref[...], preferred_element_type=jnp.float32)
        + bh_ref[...]
    )                                                          # (TR, Kpad)

    # Lane-aligned static split points.
    EXP_LO = (GL // 128) * 128        # columns below this are pure mu (no exp)
    PI_LO = (2 * GL // 128) * 128     # lane-aligned block containing all pi cols

    # mu prefix: stored raw (lane-dense slab store).
    if EXP_LO > 0:
        head_ref[:, 0:EXP_LO] = raw[:, 0:EXP_LO]

    suf = raw[:, EXP_LO:Kpad]                                  # mu-tail|sigma|pi|pad
    col = lax.broadcasted_iota(jnp.int32, suf.shape, 1) + EXP_LO
    is_mu = col < GL
    is_pi = (col >= 2 * GL) & (col < 2 * GL + G)

    # pi-softmax max over the lane-aligned tail block only (not full Kpad).
    tail = raw[:, PI_LO:Kpad]
    tcol = lax.broadcasted_iota(jnp.int32, tail.shape, 1) + PI_LO
    t_is_pi = (tcol >= 2 * GL) & (tcol < 2 * GL + G)
    m = jnp.max(jnp.where(t_is_pi, tail, -jnp.inf), axis=-1, keepdims=True)

    # Single fused exp pass: pi columns shifted by their row max, sigma columns
    # exp'd as-is; mu columns masked back afterwards.
    ex = jnp.exp(suf - jnp.where(is_pi, m, 0.0))
    ex_tail = ex[:, PI_LO - EXP_LO:Kpad - EXP_LO]
    denom = jnp.sum(jnp.where(t_is_pi, ex_tail, 0.0), axis=-1, keepdims=True)
    inv = 1.0 / denom                  # EXACT reciprocal: pi rows sum to 1.0

    out = jnp.where(is_mu, suf, ex)          # mu -> raw, sigma -> exp(raw)
    out = jnp.where(is_pi, ex * inv, out)    # pi -> softmax
    head_ref[:, EXP_LO:Kpad] = out           # lane-dense suffix store


# -----------------------------------------------------------------------------
# Parameter init (deterministic, PyTorch-style uniform(-1/sqrt(fan), 1/sqrt(fan)))
# -----------------------------------------------------------------------------
def init_params(key, action_dim, hidden_dim, latent_dim, n_gaussians):
    d_in = action_dim + latent_dim
    H, G, L = hidden_dim, n_gaussians, latent_dim
    ks = jax.random.split(key, 10)

    def unif(k, shape, fan):
        bound = 1.0 / jnp.sqrt(fan)
        return jax.random.uniform(k, shape, jnp.float32, -bound, bound)

    return {
        # LSTM (PyTorch layout, gate order [i, f, g, o])
        "w_ih": unif(ks[0], (4 * H, d_in), H),
        "w_hh": unif(ks[1], (4 * H, H), H),
        "b_ih": unif(ks[2], (4 * H,), H),
        "b_hh": unif(ks[3], (4 * H,), H),
        # MDN
        "w_pi": unif(ks[4], (G, H), H),
        "b_pi": unif(ks[5], (G,), H),
        "w_mu": unif(ks[6], (G * L, H), H),
        "b_mu": unif(ks[7], (G * L,), H),
        "w_sig": unif(ks[8], (G * L, H), H),
        "b_sig": unif(ks[9], (G * L,), H),
    }


# -----------------------------------------------------------------------------
# Wrapper: mirrors MDNRNN.forward(action, state, hidden_state=None)
# -----------------------------------------------------------------------------
@functools.partial(jax.jit,
                   static_argnames=("hidden_dim", "latent_dim", "n_gaussians"))
def mdnrnn_forward(params, action, state, hidden_dim, latent_dim, n_gaussians,
                   hidden_state=None):
    B, T, A = action.shape
    L, H, G = latent_dim, hidden_dim, n_gaussians
    d_in = A + L
    GL = G * L
    K = 2 * GL + G
    Kpad = _round_up(K, 128)          # lane-dense fused head width
    Bp = _round_up(B, 8)              # sublane-pad the batch
    ROWS = T * Bp

    # rnn_input = cat((action, state), dim=-1) -> time-major, batch padded to Bp
    rnn_input = jnp.concatenate([action, state], axis=-1).astype(jnp.float32)
    x_tm = jnp.transpose(rnn_input, (1, 0, 2))                     # (T, B, d_in)
    x2 = (jnp.zeros((T, Bp, d_in), jnp.float32)
          .at[:, :B, :].set(x_tm).reshape(ROWS, d_in))

    if hidden_state is None:
        h0 = jnp.zeros((B, H), jnp.float32)
        c0 = jnp.zeros((B, H), jnp.float32)
    else:
        h0 = hidden_state[0].reshape(B, H).astype(jnp.float32)
        c0 = hidden_state[1].reshape(B, H).astype(jnp.float32)
    h0p = jnp.zeros((Bp, H), jnp.float32).at[:B].set(h0)
    c0p = jnp.zeros((Bp, H), jnp.float32).at[:B].set(c0)

    # LSTM weights: transpose + fuse biases; gates at natural 4*H width (no pad).
    wih = params["w_ih"].T.astype(jnp.float32)                     # (d_in, 4H)
    whh = params["w_hh"].T.astype(jnp.float32)                     # (H, 4H)
    bg = (params["b_ih"] + params["b_hh"]).reshape(1, 4 * H).astype(jnp.float32)

    # MDN head: fuse mu/sigma/pi into one lane-dense weight/bias [mu|sigma|pi|pad].
    w_head_core = jnp.concatenate(
        [params["w_mu"].T, params["w_sig"].T, params["w_pi"].T], axis=1)   # (H, K)
    b_head_core = jnp.concatenate(
        [params["b_mu"], params["b_sig"], params["b_pi"]])                 # (K,)
    w_head = jnp.zeros((H, Kpad), jnp.float32).at[:, :K].set(w_head_core)
    b_head = jnp.zeros((1, Kpad), jnp.float32).at[0, :K].set(b_head_core)

    vmem_limit = _pick_vmem_limit_bytes()
    vmem = pl.BlockSpec(memory_space=pltpu.MemorySpace.VMEM)

    # ---- Kernel 1: LSTM recurrence ------------------------------------------
    lstm_cost = pl.CostEstimate(
        flops=int(2 * ROWS * 4 * H * (d_in + H)),
        transcendentals=int(ROWS * 5 * H),
        bytes_accessed=int(4 * (ROWS * d_in + d_in * 4 * H + H * 4 * H + 4 * H
                                + 4 * Bp * H + ROWS * H)),
    )
    hs, hn_p, cn_p = pl.pallas_call(
        functools.partial(_lstm_kernel, T=T, Bp=Bp, H=H),
        out_shape=(
            jax.ShapeDtypeStruct((ROWS, H), jnp.float32),    # hidden states (all t)
            jax.ShapeDtypeStruct((Bp, H), jnp.float32),      # h_n (batch-padded)
            jax.ShapeDtypeStruct((Bp, H), jnp.float32),      # c_n (batch-padded)
        ),
        in_specs=[vmem] * 6,
        out_specs=(vmem, vmem, vmem),
        scratch_shapes=[pltpu.VMEM((ROWS, 4 * H), jnp.float32)],   # x @ W_ih
        compiler_params=pltpu.CompilerParams(vmem_limit_bytes=vmem_limit),
        cost_estimate=lstm_cost,
    )(x2, wih, whh, bg, h0p, c0p)

    # ---- Kernel 2: MDN head, row-tiled "parallel" grid ----------------------
    TR = ROWS
    for cand in (512, 256, 128, 64, 32, 16, 8):
        if cand <= ROWS and ROWS % cand == 0:
            TR = cand
            break
    head_cost = pl.CostEstimate(
        flops=int(2 * ROWS * H * Kpad),
        transcendentals=int(ROWS * (Kpad - (GL // 128) * 128)),
        bytes_accessed=int(4 * (ROWS * H + H * Kpad + Kpad + ROWS * Kpad)),
    )
    head_tm = pl.pallas_call(
        functools.partial(_mdn_head_kernel, GL=GL, G=G, Kpad=Kpad),
        out_shape=jax.ShapeDtypeStruct((ROWS, Kpad), jnp.float32),
        grid=(ROWS // TR,),
        in_specs=[
            pl.BlockSpec((TR, H), lambda i: (i, 0)),
            pl.BlockSpec((H, Kpad), lambda i: (0, 0)),
            pl.BlockSpec((1, Kpad), lambda i: (0, 0)),
        ],
        out_specs=pl.BlockSpec((TR, Kpad), lambda i: (i, 0)),
        compiler_params=pltpu.CompilerParams(
            dimension_semantics=("parallel",),
            vmem_limit_bytes=vmem_limit),
        cost_estimate=head_cost,
    )(hs, w_head, b_head)

    # ---- Split fused slab, drop batch padding, restore batch_first ----------
    head = head_tm.reshape(T, Bp, Kpad)[:, :B, :].transpose(1, 0, 2)   # (B,T,Kpad)
    mu = head[..., :GL].reshape(B, T, G, L)
    sigma = head[..., GL:2 * GL].reshape(B, T, G, L)
    pi = head[..., 2 * GL:2 * GL + G]                                  # (B, T, G)

    # nn.LSTM returns (h_n, c_n) with shape (num_layers=1, B, H) each.
    hidden_out = (hn_p[:B][None, :, :], cn_p[:B][None, :, :])
    return pi, mu, sigma, hidden_out


# -----------------------------------------------------------------------------
# Pure-JAX reference (sanity check)
# -----------------------------------------------------------------------------
def mdnrnn_reference(params, action, state, hidden_dim, latent_dim, n_gaussians):
    HI = jax.lax.Precision.HIGHEST
    B, T, A = action.shape
    H, G, L = hidden_dim, n_gaussians, latent_dim
    x = jnp.concatenate([action, state], axis=-1).astype(jnp.float32)
    h = jnp.zeros((B, H), jnp.float32)
    c = jnp.zeros((B, H), jnp.float32)
    hs = []
    for t in range(T):
        gates = (jnp.dot(x[:, t], params["w_ih"].T, precision=HI)
                 + jnp.dot(h, params["w_hh"].T, precision=HI)
                 + params["b_ih"] + params["b_hh"])
        i_g = jax.nn.sigmoid(gates[:, 0 * H:1 * H])
        f_g = jax.nn.sigmoid(gates[:, 1 * H:2 * H])
        g_g = jnp.tanh(gates[:, 2 * H:3 * H])
        o_g = jax.nn.sigmoid(gates[:, 3 * H:4 * H])
        c = f_g * c + i_g * g_g
        h = o_g * jnp.tanh(c)
        hs.append(h)
    out = jnp.stack(hs, axis=1).reshape(B * T, H)
    pi = jax.nn.softmax(jnp.dot(out, params["w_pi"].T, precision=HI)
                        + params["b_pi"], axis=1)
    mu = (jnp.dot(out, params["w_mu"].T, precision=HI) + params["b_mu"]
          ).reshape(-1, G, L)
    sigma = jnp.exp(jnp.dot(out, params["w_sig"].T, precision=HI)
                    + params["b_sig"]).reshape(-1, G, L)
    return (pi.reshape(B, T, G), mu.reshape(B, T, G, L),
            sigma.reshape(B, T, G, L), (h[None], c[None]))


if __name__ == "__main__":
    batch, seq = 2, 8
    action_dim, hidden_dim, latent_dim, n_gaussians = 4, 32, 32, 5

    key = jax.random.PRNGKey(0)
    k_par, k_act, k_sta = jax.random.split(key, 3)

    params = init_params(k_par, action_dim, hidden_dim, latent_dim, n_gaussians)
    action = jax.random.normal(k_act, (batch, seq, action_dim), jnp.float32)
    state = jax.random.normal(k_sta, (batch, seq, latent_dim), jnp.float32)

    pi, mu, sigma, hidden = mdnrnn_forward(
        params, action, state, hidden_dim, latent_dim, n_gaussians)
    jax.block_until_ready((pi, mu, sigma, hidden))

    # Sanity check against pure-JAX reference.
    pi_r, mu_r, sigma_r, hid_r = mdnrnn_reference(
        params, action, state, hidden_dim, latent_dim, n_gaussians)
    assert pi.shape == (batch, seq, n_gaussians)
    assert mu.shape == (batch, seq, n_gaussians, latent_dim)
    assert sigma.shape == (batch, seq, n_gaussians, latent_dim)
    assert hidden[0].shape == (1, batch, hidden_dim)
    assert hidden[1].shape == (1, batch, hidden_dim)
    assert jnp.allclose(jnp.sum(pi, axis=-1), 1.0, atol=1e-3)
    assert jnp.allclose(pi, pi_r, atol=2e-3)
    assert jnp.allclose(mu, mu_r, atol=2e-3)
    assert jnp.allclose(sigma, sigma_r, rtol=5e-3, atol=1e-3)
    assert jnp.allclose(hidden[0], hid_r[0], atol=2e-3)
    assert jnp.allclose(hidden[1], hid_r[1], atol=2e-3)

    print("KERNEL_OK")
</pallas_src>

<mosaic_0001>
module attributes {stable_mosaic.version = 11 : i64} {
  func.func @_lstm_kernel(%arg0: memref<64x36xf32, #tpu.memory_space<vmem>>, %arg1: memref<36x128xf32, #tpu.memory_space<vmem>>, %arg2: memref<32x128xf32, #tpu.memory_space<vmem>>, %arg3: memref<1x128xf32, #tpu.memory_space<vmem>>, %arg4: memref<8x32xf32, #tpu.memory_space<vmem>>, %arg5: memref<8x32xf32, #tpu.memory_space<vmem>>, %arg6: memref<64x32xf32, #tpu.memory_space<vmem>>, %arg7: memref<8x32xf32, #tpu.memory_space<vmem>>, %arg8: memref<8x32xf32, #tpu.memory_space<vmem>>, %arg9: memref<64x128xf32, #tpu.memory_space<vmem>>) attributes {dimension_semantics = [], scalar_prefetch = 0 : i64, scratch_operands = 1 : i64, tpu.core_type = #tpu.core_type<tc>} {
    %c0 = arith.constant 0 : index
    %c0_0 = arith.constant 0 : index
    %0 = vector.load %arg0[%c0, %c0_0] : memref<64x36xf32, #tpu.memory_space<vmem>>, vector<64x36xf32>
    %c0_1 = arith.constant 0 : index
    %c0_2 = arith.constant 0 : index
    %1 = vector.load %arg1[%c0_1, %c0_2] : memref<36x128xf32, #tpu.memory_space<vmem>>, vector<36x128xf32>
    %cst = arith.constant dense<0.000000e+00> : vector<64x128xf32>
    %2 = tpu.matmul %0, %1, %cst {dimension_numbers = #tpu.dot_dimension_numbers<[1], [0], [0], [1], [0, 0, 1, 1], [], []>} : vector<64x36xf32>, vector<36x128xf32>, vector<64x128xf32> -> vector<64x128xf32>
    %c0_3 = arith.constant 0 : index
    %c0_4 = arith.constant 0 : index
    %3 = vector.load %arg3[%c0_3, %c0_4] : memref<1x128xf32, #tpu.memory_space<vmem>>, vector<1x128xf32>
    %4 = vector.broadcast %3 : vector<1x128xf32> to vector<64x128xf32>
    %5 = arith.addf %2, %4 : vector<64x128xf32>
    %c0_5 = arith.constant 0 : index
    %c0_6 = arith.constant 0 : index
    %6 = vector.load %arg9[%c0_5, %c0_6] : memref<64x128xf32, #tpu.memory_space<vmem>>, vector<64x128xf32>
    tpu.vector_store %arg9[%c0_5, %c0_6], %5 {strides = array<i32>} : memref<64x128xf32, #tpu.memory_space<vmem>>, vector<64x128xf32>,
    %c0_7 = arith.constant 0 : index
    %c0_8 = arith.constant 0 : index
    %7 = vector.load %arg4[%c0_7, %c0_8] : memref<8x32xf32, #tpu.memory_space<vmem>>, vector<8x32xf32>
    %c0_9 = arith.constant 0 : index
    %c0_10 = arith.constant 0 : index
    %8 = vector.load %arg5[%c0_9, %c0_10] : memref<8x32xf32, #tpu.memory_space<vmem>>, vector<8x32xf32>
    %c0_i32 = arith.constant 0 : i32
    %c8_i32 = arith.constant 8 : i32
    %9 = arith.muli %c0_i32, %c8_i32 : i32
    %10 = tpu.assume_multiple %9, 8 : i32
    %11 = arith.index_cast %10 : i32 to index
    %c0_11 = arith.constant 0 : index
    %12 = vector.load %arg9[%11, %c0_11] : memref<64x128xf32, #tpu.memory_space<vmem>>, vector<8x128xf32>
    %c0_12 = arith.constant 0 : index
    %c0_13 = arith.constant 0 : index
    %13 = vector.load %arg2[%c0_12, %c0_13] : memref<32x128xf32, #tpu.memory_space<vmem>>, vector<32x128xf32>
    %cst_14 = arith.constant dense<0.000000e+00> : vector<8x128xf32>
    %14 = tpu.matmul %7, %13, %cst_14 {dimension_numbers = #tpu.dot_dimension_numbers<[1], [0], [0], [1], [0, 0, 1, 1], [], []>} : vector<8x32xf32>, vector<32x128xf32>, vector<8x128xf32> -> vector<8x128xf32>
    %15 = arith.addf %12, %14 : vector<8x128xf32>
    %16 = vector.extract_strided_slice %15 {offsets = [0, 0], sizes = [8, 32], strides = [1, 1]} : vector<8x128xf32> to vector<8x32xf32>
    %17 = arith.negf %16 : vector<8x32xf32>
    %18 = math.exp %17 : vector<8x32xf32>
    %cst_15 = arith.constant 1.000000e+00 : f32
    %19 = vector.broadcast %cst_15 : f32 to vector<8x32xf32>
    %20 = arith.addf %19, %18 : vector<8x32xf32>
    %21 = arith.divf %19, %20 : vector<8x32xf32>
    %22 = vector.extract_strided_slice %15 {offsets = [0, 32], sizes = [8, 32], strides = [1, 1]} : vector<8x128xf32> to vector<8x32xf32>
    %23 = arith.negf %22 : vector<8x32xf32>
    %24 = math.exp %23 : vector<8x32xf32>
    %cst_16 = arith.constant 1.000000e+00 : f32
    %25 = vector.broadcast %cst_16 : f32 to vector<8x32xf32>
    %26 = arith.addf %25, %24 : vector<8x32xf32>
    %27 = arith.divf %25, %26 : vector<8x32xf32>
    %28 = vector.extract_strided_slice %15 {offsets = [0, 64], sizes = [8, 32], strides = [1, 1]} : vector<8x128xf32> to vector<8x32xf32>
    %29 = math.tanh %28 : vector<8x32xf32>
    %30 = vector.extract_strided_slice %15 {offsets = [0, 96], sizes = [8, 32], strides = [1, 1]} : vector<8x128xf32> to vector<8x32xf32>
    %31 = arith.negf %30 : vector<8x32xf32>
    %32 = math.exp %31 : vector<8x32xf32>
    %cst_17 = arith.constant 1.000000e+00 : f32
    %33 = vector.broadcast %cst_17 : f32 to vector<8x32xf32>
    %34 = arith.addf %33, %32 : vector<8x32xf32>
    %35 = arith.divf %33, %34 : vector<8x32xf32>
    %36 = arith.mulf %27, %8 : vector<8x32xf32>
    %37 = arith.mulf %21, %29 : vector<8x32xf32>
    %38 = arith.addf %36, %37 : vector<8x32xf32>
    %39 = math.tanh %38 : vector<8x32xf32>
    %40 = arith.mulf %35, %39 : vector<8x32xf32>
    %41 = arith.index_cast %10 : i32 to index
    %c0_18 = arith.constant 0 : index
    %42 = vector.load %arg6[%41, %c0_18] : memref<64x32xf32, #tpu.memory_space<vmem>>, vector<8x32xf32>
    tpu.vector_store %arg6[%41, %c0_18], %40 {strides = array<i32>} : memref<64x32xf32, #tpu.memory_space<vmem>>, vector<8x32xf32>,
    %c1_i32 = arith.constant 1 : i32
    %c8_i32_19 = arith.constant 8 : i32
    %43 = arith.muli %c1_i32, %c8_i32_19 : i32
    %44 = tpu.assume_multiple %43, 8 : i32
    %45 = arith.index_cast %44 : i32 to index
    %c0_20 = arith.constant 0 : index
    %46 = vector.load %arg9[%45, %c0_20] : memref<64x128xf32, #tpu.memory_space<vmem>>, vector<8x128xf32>
    %c0_21 = arith.constant 0 : index
    %c0_22 = arith.constant 0 : index
    %47 = vector.load %arg2[%c0_21, %c0_22] : memref<32x128xf32, #tpu.memory_space<vmem>>, vector<32x128xf32>
    %cst_23 = arith.constant dense<0.000000e+00> : vector<8x128xf32>
    %48 = tpu.matmul %40, %47, %cst_23 {dimension_numbers = #tpu.dot_dimension_numbers<[1], [0], [0], [1], [0, 0, 1, 1], [], []>} : vector<8x32xf32>, vector<32x128xf32>, vector<8x128xf32> -> vector<8x128xf32>
    %49 = arith.addf %46, %48 : vector<8x128xf32>
    %50 = vector.extract_strided_slice %49 {offsets = [0, 0], sizes = [8, 32], strides = [1, 1]} : vector<8x128xf32> to vector<8x32xf32>
    %51 = arith.negf %50 : vector<8x32xf32>
    %52 = math.exp %51 : vector<8x32xf32>
    %cst_24 = arith.constant 1.000000e+00 : f32
    %53 = vector.broadcast %cst_24 : f32 to vector<8x32xf32>
    %54 = arith.addf %53, %52 : vector<8x32xf32>
    %55 = arith.divf %53, %54 : vector<8x32xf32>
    %56 = vector.extract_strided_slice %49 {offsets = [0, 32], sizes = [8, 32], strides = [1, 1]} : vector<8x128xf32> to vector<8x32xf32>
    %57 = arith.negf %56 : vector<8x32xf32>
    %58 = math.exp %57 : vector<8x32xf32>
    %cst_25 = arith.constant 1.000000e+00 : f32
    %59 = vector.broadcast %cst_25 : f32 to vector<8x32xf32>
    %60 = arith.addf %59, %58 : vector<8x32xf32>
    %61 = arith.divf %59, %60 : vector<8x32xf32>
    %62 = vector.extract_strided_slice %49 {offsets = [0, 64], sizes = [8, 32], strides = [1, 1]} : vector<8x128xf32> to vector<8x32xf32>
    %63 = math.tanh %62 : vector<8x32xf32>
    %64 = vector.extract_strided_slice %49 {offsets = [0, 96], sizes = [8, 32], strides = [1, 1]} : vector<8x128xf32> to vector<8x32xf32>
    %65 = arith.negf %64 : vector<8x32xf32>
    %66 = math.exp %65 : vector<8x32xf32>
    %cst_26 = arith.constant 1.000000e+00 : f32
    %67 = vector.broadcast %cst_26 : f32 to vector<8x32xf32>
    %68 = arith.addf %67, %66 : vector<8x32xf32>
    %69 = arith.divf %67, %68 : vector<8x32xf32>
    %70 = arith.mulf %61, %38 : vector<8x32xf32>
    %71 = arith.mulf %55, %63 : vector<8x32xf32>
    %72 = arith.addf %70, %71 : vector<8x32xf32>
    %73 = math.tanh %72 : vector<8x32xf32>
    %74 = arith.mulf %69, %73 : vector<8x32xf32>
    %75 = arith.index_cast %44 : i32 to index
    %c0_27 = arith.constant 0 : index
    %76 = vector.load %arg6[%75, %c0_27] : memref<64x32xf32, #tpu.memory_space<vmem>>, vector<8x32xf32>
    tpu.vector_store %arg6[%75, %c0_27], %74 {strides = array<i32>} : memref<64x32xf32, #tpu.memory_space<vmem>>, vector<8x32xf32>,
    %c2_i32 = arith.constant 2 : i32
    %c8_i32_28 = arith.constant 8 : i32
    %77 = arith.muli %c2_i32, %c8_i32_28 : i32
    %78 = tpu.assume_multiple %77, 8 : i32
    %79 = arith.index_cast %78 : i32 to index
    %c0_29 = arith.constant 0 : index
    %80 = vector.load %arg9[%79, %c0_29] : memref<64x128xf32, #tpu.memory_space<vmem>>, vector<8x128xf32>
    %c0_30 = arith.constant 0 : index
    %c0_31 = arith.constant 0 : index
    %81 = vector.load %arg2[%c0_30, %c0_31] : memref<32x128xf32, #tpu.memory_space<vmem>>, vector<32x128xf32>
    %cst_32 = arith.constant dense<0.000000e+00> : vector<8x128xf32>
    %82 = tpu.matmul %74, %81, %cst_32 {dimension_numbers = #tpu.dot_dimension_numbers<[1], [0], [0], [1], [0, 0, 1, 1], [], []>} : vector<8x32xf32>, vector<32x128xf32>, vector<8x128xf32> -> vector<8x128xf32>
    %83 = arith.addf %80, %82 : vector<8x128xf32>
    %84 = vector.extract_strided_slice %83 {offsets = [0, 0], sizes = [8, 32], strides = [1, 1]} : vector<8x128xf32> to vector<8x32xf32>
    %85 = arith.negf %84 : vector<8x32xf32>
    %86 = math.exp %85 : vector<8x32xf32>
    %cst_33 = arith.constant 1.000000e+00 : f32
    %87 = vector.broadcast %cst_33 : f32 to vector<8x32xf32>
    %88 = arith.addf %87, %86 : vector<8x32xf32>
    %89 = arith.divf %87, %88 : vector<8x32xf32>
    %90 = vector.extract_strided_slice %83 {offsets = [0, 32], sizes = [8, 32], strides = [1, 1]} : vector<8x128xf32> to vector<8x32xf32>
    %91 = arith.negf %90 : vector<8x32xf32>
    %92 = math.exp %91 : vector<8x32xf32>
    %cst_34 = arith.constant 1.000000e+00 : f32
    %93 = vector.broadcast %cst_34 : f32 to vector<8x32xf32>
    %94 = arith.addf %93, %92 : vector<8x32xf32>
    %95 = arith.divf %93, %94 : vector<8x32xf32>
    %96 = vector.extract_strided_slice %83 {offsets = [0, 64], sizes = [8, 32], strides = [1, 1]} : vector<8x128xf32> to vector<8x32xf32>
    %97 = math.tanh %96 : vector<8x32xf32>
    %98 = vector.extract_strided_slice %83 {offsets = [0, 96], sizes = [8, 32], strides = [1, 1]} : vector<8x128xf32> to vector<8x32xf32>
    %99 = arith.negf %98 : vector<8x32xf32>
    %100 = math.exp %99 : vector<8x32xf32>
    %cst_35 = arith.constant 1.000000e+00 : f32
    %101 = vector.broadcast %cst_35 : f32 to vector<8x32xf32>
    %102 = arith.addf %101, %100 : vector<8x32xf32>
    %103 = arith.divf %101, %102 : vector<8x32xf32>
    %104 = arith.mulf %95, %72 : vector<8x32xf32>
    %105 = arith.mulf %89, %97 : vector<8x32xf32>
    %106 = arith.addf %104, %105 : vector<8x32xf32>
    %107 = math.tanh %106 : vector<8x32xf32>
    %108 = arith.mulf %103, %107 : vector<8x32xf32>
    %109 = arith.index_cast %78 : i32 to index
    %c0_36 = arith.constant 0 : index
    %110 = vector.load %arg6[%109, %c0_36] : memref<64x32xf32, #tpu.memory_space<vmem>>, vector<8x32xf32>
    tpu.vector_store %arg6[%109, %c0_36], %108 {strides = array<i32>} : memref<64x32xf32, #tpu.memory_space<vmem>>, vector<8x32xf32>,
    %c3_i32 = arith.constant 3 : i32
    %c8_i32_37 = arith.constant 8 : i32
    %111 = arith.muli %c3_i32, %c8_i32_37 : i32
    %112 = tpu.assume_multiple %111, 8 : i32
    %113 = arith.index_cast %112 : i32 to index
    %c0_38 = arith.constant 0 : index
    %114 = vector.load %arg9[%113, %c0_38] : memref<64x128xf32, #tpu.memory_space<vmem>>, vector<8x128xf32>
    %c0_39 = arith.constant 0 : index
    %c0_40 = arith.constant 0 : index
    %115 = vector.load %arg2[%c0_39, %c0_40] : memref<32x128xf32, #tpu.memory_space<vmem>>, vector<32x128xf32>
    %cst_41 = arith.constant dense<0.000000e+00> : vector<8x128xf32>
    %116 = tpu.matmul %108, %115, %cst_41 {dimension_numbers = #tpu.dot_dimension_numbers<[1], [0], [0], [1], [0, 0, 1, 1], [], []>} : vector<8x32xf32>, vector<32x128xf32>, vector<8x128xf32> -> vector<8x128xf32>
    %117 = arith.addf %114, %116 : vector<8x128xf32>
    %118 = vector.extract_strided_slice %117 {offsets = [0, 0], sizes = [8, 32], strides = [1, 1]} : vector<8x128xf32> to vector<8x32xf32>
    %119 = arith.negf %118 : vector<8x32xf32>
    %120 = math.exp %119 : vector<8x32xf32>
    %cst_42 = arith.constant 1.000000e+00 : f32
    %121 = vector.broadcast %cst_42 : f32 to vector<8x32xf32>
    %122 = arith.addf %121, %120 : vector<8x32xf32>
    %123 = arith.divf %121, %122 : vector<8x32xf32>
    %124 = vector.extract_strided_slice %117 {offsets = [0, 32], sizes = [8, 32], strides = [1, 1]} : vector<8x128xf32> to vector<8x32xf32>
    %125 = arith.negf %124 : vector<8x32xf32>
    %126 = math.exp %125 : vector<8x32xf32>
    %cst_43 = arith.constant 1.000000e+00 : f32
    %127 = vector.broadcast %cst_43 : f32 to vector<8x32xf32>
    %128 = arith.addf %127, %126 : vector<8x32xf32>
    %129 = arith.divf %127, %128 : vector<8x32xf32>
    %130 = vector.extract_strided_slice %117 {offsets = [0, 64], sizes = [8, 32], strides = [1, 1]} : vector<8x128xf32> to vector<8x32xf32>
    %131 = math.tanh %130 : vector<8x32xf32>
    %132 = vector.extract_strided_slice %117 {offsets = [0, 96], sizes = [8, 32], strides = [1, 1]} : vector<8x128xf32> to vector<8x32xf32>
    %133 = arith.negf %132 : vector<8x32xf32>
    %134 = math.exp %133 : vector<8x32xf32>
    %cst_44 = arith.constant 1.000000e+00 : f32
    %135 = vector.broadcast %cst_44 : f32 to vector<8x32xf32>
    %136 = arith.addf %135, %134 : vector<8x32xf32>
    %137 = arith.divf %135, %136 : vector<8x32xf32>
    %138 = arith.mulf %129, %106 : vector<8x32xf32>
    %139 = arith.mulf %123, %131 : vector<8x32xf32>
    %140 = arith.addf %138, %139 : vector<8x32xf32>
    %141 = math.tanh %140 : vector<8x32xf32>
    %142 = arith.mulf %137, %141 : vector<8x32xf32>
    %143 = arith.index_cast %112 : i32 to index
    %c0_45 = arith.constant 0 : index
    %144 = vector.load %arg6[%143, %c0_45] : memref<64x32xf32, #tpu.memory_space<vmem>>, vector<8x32xf32>
    tpu.vector_store %arg6[%143, %c0_45], %142 {strides = array<i32>} : memref<64x32xf32, #tpu.memory_space<vmem>>, vector<8x32xf32>,
    %c4_i32 = arith.constant 4 : i32
    %c8_i32_46 = arith.constant 8 : i32
    %145 = arith.muli %c4_i32, %c8_i32_46 : i32
    %146 = tpu.assume_multiple %145, 8 : i32
    %147 = arith.index_cast %146 : i32 to index
    %c0_47 = arith.constant 0 : index
    %148 = vector.load %arg9[%147, %c0_47] : memref<64x128xf32, #tpu.memory_space<vmem>>, vector<8x128xf32>
    %c0_48 = arith.constant 0 : index
    %c0_49 = arith.constant 0 : index
    %149 = vector.load %arg2[%c0_48, %c0_49] : memref<32x128xf32, #tpu.memory_space<vmem>>, vector<32x128xf32>
    %cst_50 = arith.constant dense<0.000000e+00> : vector<8x128xf32>
    %150 = tpu.matmul %142, %149, %cst_50 {dimension_numbers = #tpu.dot_dimension_numbers<[1], [0], [0], [1], [0, 0, 1, 1], [], []>} : vector<8x32xf32>, vector<32x128xf32>, vector<8x128xf32> -> vector<8x128xf32>
    %151 = arith.addf %148, %150 : vector<8x128xf32>
    %152 = vector.extract_strided_slice %151 {offsets = [0, 0], sizes = [8, 32], strides = [1, 1]} : vector<8x128xf32> to vector<8x32xf32>
    %153 = arith.negf %152 : vector<8x32xf32>
    %154 = math.exp %153 : vector<8x32xf32>
    %cst_51 = arith.constant 1.000000e+00 : f32
    %155 = vector.broadcast %cst_51 : f32 to vector<8x32xf32>
    %156 = arith.addf %155, %154 : vector<8x32xf32>
    %157 = arith.divf %155, %156 : vector<8x32xf32>
    %158 = vector.extract_strided_slice %151 {offsets = [0, 32], sizes = [8, 32], strides = [1, 1]} : vector<8x128xf32> to vector<8x32xf32>
    %159 = arith.negf %158 : vector<8x32xf32>
    %160 = math.exp %159 : vector<8x32xf32>
    %cst_52 = arith.constant 1.000000e+00 : f32
    %161 = vector.broadcast %cst_52 : f32 to vector<8x32xf32>
    %162 = arith.addf %161, %160 : vector<8x32xf32>
    %163 = arith.divf %161, %162 : vector<8x32xf32>
    %164 = vector.extract_strided_slice %151 {offsets = [0, 64], sizes = [8, 32], strides = [1, 1]} : vector<8x128xf32> to vector<8x32xf32>
    %165 = math.tanh %164 : vector<8x32xf32>
    %166 = vector.extract_strided_slice %151 {offsets = [0, 96], sizes = [8, 32], strides = [1, 1]} : vector<8x128xf32> to vector<8x32xf32>
    %167 = arith.negf %166 : vector<8x32xf32>
    %168 = math.exp %167 : vector<8x32xf32>
    %cst_53 = arith.constant 1.000000e+00 : f32
    %169 = vector.broadcast %cst_53 : f32 to vector<8x32xf32>
    %170 = arith.addf %169, %168 : vector<8x32xf32>
    %171 = arith.divf %169, %170 : vector<8x32xf32>
    %172 = arith.mulf %163, %140 : vector<8x32xf32>
    %173 = arith.mulf %157, %165 : vector<8x32xf32>
    %174 = arith.addf %172, %173 : vector<8x32xf32>
    %175 = math.tanh %174 : vector<8x32xf32>
    %176 = arith.mulf %171, %175 : vector<8x32xf32>
    %177 = arith.index_cast %146 : i32 to index
    %c0_54 = arith.constant 0 : index
    %178 = vector.load %arg6[%177, %c0_54] : memref<64x32xf32, #tpu.memory_space<vmem>>, vector<8x32xf32>
    tpu.vector_store %arg6[%177, %c0_54], %176 {strides = array<i32>} : memref<64x32xf32, #tpu.memory_space<vmem>>, vector<8x32xf32>,
    %c5_i32 = arith.constant 5 : i32
    %c8_i32_55 = arith.constant 8 : i32
    %179 = arith.muli %c5_i32, %c8_i32_55 : i32
    %180 = tpu.assume_multiple %179, 8 : i32
    %181 = arith.index_cast %180 : i32 to index
    %c0_56 = arith.constant 0 : index
    %182 = vector.load %arg9[%181, %c0_56] : memref<64x128xf32, #tpu.memory_space<vmem>>, vector<8x128xf32>
    %c0_57 = arith.constant 0 : index
    %c0_58 = arith.constant 0 : index
    %183 = vector.load %arg2[%c0_57, %c0_58] : memref<32x128xf32, #tpu.memory_space<vmem>>, vector<32x128xf32>
    %cst_59 = arith.constant dense<0.000000e+00> : vector<8x128xf32>
    %184 = tpu.matmul %176, %183, %cst_59 {dimension_numbers = #tpu.dot_dimension_numbers<[1], [0], [0], [1], [0, 0, 1, 1], [], []>} : vector<8x32xf32>, vector<32x128xf32>, vector<8x128xf32> -> vector<8x128xf32>
    %185 = arith.addf %182, %184 : vector<8x128xf32>
    %186 = vector.extract_strided_slice %185 {offsets = [0, 0], sizes = [8, 32], strides = [1, 1]} : vector<8x128xf32> to vector<8x32xf32>
    %187 = arith.negf %186 : vector<8x32xf32>
    %188 = math.exp %187 : vector<8x32xf32>
    %cst_60 = arith.constant 1.000000e+00 : f32
    %189 = vector.broadcast %cst_60 : f32 to vector<8x32xf32>
    %190 = arith.addf %189, %188 : vector<8x32xf32>
    %191 = arith.divf %189, %190 : vector<8x32xf32>
    %192 = vector.extract_strided_slice %185 {offsets = [0, 32], sizes = [8, 32], strides = [1, 1]} : vector<8x128xf32> to vector<8x32xf32>
    %193 = arith.negf %192 : vector<8x32xf32>
    %194 = math.exp %193 : vector<8x32xf32>
    %cst_61 = arith.constant 1.000000e+00 : f32
    %195 = vector.broadcast %cst_61 : f32 to vector<8x32xf32>
    %196 = arith.addf %195, %194 : vector<8x32xf32>
    %197 = arith.divf %195, %196 : vector<8x32xf32>
    %198 = vector.extract_strided_slice %185 {offsets = [0, 64], sizes = [8, 32], strides = [1, 1]} : vector<8x128xf32> to vector<8x32xf32>
    %199 = math.tanh %198 : vector<8x32xf32>
    %200 = vector.extract_strided_slice %185 {offsets = [0, 96], sizes = [8, 32], strides = [1, 1]} : vector<8x128xf32> to vector<8x32xf32>
    %201 = arith.negf %200 : vector<8x32xf32>
    %202 = math.exp %201 : vector<8x32xf32>
    %cst_62 = arith.constant 1.000000e+00 : f32
    %203 = vector.broadcast %cst_62 : f32 to vector<8x32xf32>
    %204 = arith.addf %203, %202 : vector<8x32xf32>
    %205 = arith.divf %203, %204 : vector<8x32xf32>
    %206 = arith.mulf %197, %174 : vector<8x32xf32>
    %207 = arith.mulf %191, %199 : vector<8x32xf32>
    %208 = arith.addf %206, %207 : vector<8x32xf32>
    %209 = math.tanh %208 : vector<8x32xf32>
    %210 = arith.mulf %205, %209 : vector<8x32xf32>
    %211 = arith.index_cast %180 : i32 to index
    %c0_63 = arith.constant 0 : index
    %212 = vector.load %arg6[%211, %c0_63] : memref<64x32xf32, #tpu.memory_space<vmem>>, vector<8x32xf32>
    tpu.vector_store %arg6[%211, %c0_63], %210 {strides = array<i32>} : memref<64x32xf32, #tpu.memory_space<vmem>>, vector<8x32xf32>,
    %c6_i32 = arith.constant 6 : i32
    %c8_i32_64 = arith.constant 8 : i32
    %213 = arith.muli %c6_i32, %c8_i32_64 : i32
    %214 = tpu.assume_multiple %213, 8 : i32
    %215 = arith.index_cast %214 : i32 to index
    %c0_65 = arith.constant 0 : index
    %216 = vector.load %arg9[%215, %c0_65] : memref<64x128xf32, #tpu.memory_space<vmem>>, vector<8x128xf32>
    %c0_66 = arith.constant 0 : index
    %c0_67 = arith.constant 0 : index
    %217 = vector.load %arg2[%c0_66, %c0_67] : memref<32x128xf32, #tpu.memory_space<vmem>>, vector<32x128xf32>
    %cst_68 = arith.constant dense<0.000000e+00> : vector<8x128xf32>
    %218 = tpu.matmul %210, %217, %cst_68 {dimension_numbers = #tpu.dot_dimension_numbers<[1], [0], [0], [1], [0, 0, 1, 1], [], []>} : vector<8x32xf32>, vector<32x128xf32>, vector<8x128xf32> -> vector<8x128xf32>
    %219 = arith.addf %216, %218 : vector<8x128xf32>
    %220 = vector.extract_strided_slice %219 {offsets = [0, 0], sizes = [8, 32], strides = [1, 1]} : vector<8x128xf32> to vector<8x32xf32>
    %221 = arith.negf %220 : vector<8x32xf32>
    %222 = math.exp %221 : vector<8x32xf32>
    %cst_69 = arith.constant 1.000000e+00 : f32
    %223 = vector.broadcast %cst_69 : f32 to vector<8x32xf32>
    %224 = arith.addf %223, %222 : vector<8x32xf32>
    %225 = arith.divf %223, %224 : vector<8x32xf32>
    %226 = vector.extract_strided_slice %219 {offsets = [0, 32], sizes = [8, 32], strides = [1, 1]} : vector<8x128xf32> to vector<8x32xf32>
    %227 = arith.negf %226 : vector<8x32xf32>
    %228 = math.exp %227 : vector<8x32xf32>
    %cst_70 = arith.constant 1.000000e+00 : f32
    %229 = vector.broadcast %cst_70 : f32 to vector<8x32xf32>
    %230 = arith.addf %229, %228 : vector<8x32xf32>
    %231 = arith.divf %229, %230 : vector<8x32xf32>
    %232 = vector.extract_strided_slice %219 {offsets = [0, 64], sizes = [8, 32], strides = [1, 1]} : vector<8x128xf32> to vector<8x32xf32>
    %233 = math.tanh %232 : vector<8x32xf32>
    %234 = vector.extract_strided_slice %219 {offsets = [0, 96], sizes = [8, 32], strides = [1, 1]} : vector<8x128xf32> to vector<8x32xf32>
    %235 = arith.negf %234 : vector<8x32xf32>
    %236 = math.exp %235 : vector<8x32xf32>
    %cst_71 = arith.constant 1.000000e+00 : f32
    %237 = vector.broadcast %cst_71 : f32 to vector<8x32xf32>
    %238 = arith.addf %237, %236 : vector<8x32xf32>
    %239 = arith.divf %237, %238 : vector<8x32xf32>
    %240 = arith.mulf %231, %208 : vector<8x32xf32>
    %241 = arith.mulf %225, %233 : vector<8x32xf32>
    %242 = arith.addf %240, %241 : vector<8x32xf32>
    %243 = math.tanh %242 : vector<8x32xf32>
    %244 = arith.mulf %239, %243 : vector<8x32xf32>
    %245 = arith.index_cast %214 : i32 to index
    %c0_72 = arith.constant 0 : index
    %246 = vector.load %arg6[%245, %c0_72] : memref<64x32xf32, #tpu.memory_space<vmem>>, vector<8x32xf32>
    tpu.vector_store %arg6[%245, %c0_72], %244 {strides = array<i32>} : memref<64x32xf32, #tpu.memory_space<vmem>>, vector<8x32xf32>,
    %c7_i32 = arith.constant 7 : i32
    %c8_i32_73 = arith.constant 8 : i32
    %247 = arith.muli %c7_i32, %c8_i32_73 : i32
    %248 = tpu.assume_multiple %247, 8 : i32
    %249 = arith.index_cast %248 : i32 to index
    %c0_74 = arith.constant 0 : index
    %250 = vector.load %arg9[%249, %c0_74] : memref<64x128xf32, #tpu.memory_space<vmem>>, vector<8x128xf32>
    %c0_75 = arith.constant 0 : index
    %c0_76 = arith.constant 0 : index
    %251 = vector.load %arg2[%c0_75, %c0_76] : memref<32x128xf32, #tpu.memory_space<vmem>>, vector<32x128xf32>
    %cst_77 = arith.constant dense<0.000000e+00> : vector<8x128xf32>
    %252 = tpu.matmul %244, %251, %cst_77 {dimension_numbers = #tpu.dot_dimension_numbers<[1], [0], [0], [1], [0, 0, 1, 1], [], []>} : vector<8x32xf32>, vector<32x128xf32>, vector<8x128xf32> -> vector<8x128xf32>
    %253 = arith.addf %250, %252 : vector<8x128xf32>
    %254 = vector.extract_strided_slice %253 {offsets = [0, 0], sizes = [8, 32], strides = [1, 1]} : vector<8x128xf32> to vector<8x32xf32>
    %255 = arith.negf %254 : vector<8x32xf32>
    %256 = math.exp %255 : vector<8x32xf32>
    %cst_78 = arith.constant 1.000000e+00 : f32
    %257 = vector.broadcast %cst_78 : f32 to vector<8x32xf32>
    %258 = arith.addf %257, %256 : vector<8x32xf32>
    %259 = arith.divf %257, %258 : vector<8x32xf32>
    %260 = vector.extract_strided_slice %253 {offsets = [0, 32], sizes = [8, 32], strides = [1, 1]} : vector<8x128xf32> to vector<8x32xf32>
    %261 = arith.negf %260 : vector<8x32xf32>
    %262 = math.exp %261 : vector<8x32xf32>
    %cst_79 = arith.constant 1.000000e+00 : f32
    %263 = vector.broadcast %cst_79 : f32 to vector<8x32xf32>
    %264 = arith.addf %263, %262 : vector<8x32xf32>
    %265 = arith.divf %263, %264 : vector<8x32xf32>
    %266 = vector.extract_strided_slice %253 {offsets = [0, 64], sizes = [8, 32], strides = [1, 1]} : vector<8x128xf32> to vector<8x32xf32>
    %267 = math.tanh %266 : vector<8x32xf32>
    %268 = vector.extract_strided_slice %253 {offsets = [0, 96], sizes = [8, 32], strides = [1, 1]} : vector<8x128xf32> to vector<8x32xf32>
    %269 = arith.negf %268 : vector<8x32xf32>
    %270 = math.exp %269 : vector<8x32xf32>
    %cst_80 = arith.constant 1.000000e+00 : f32
    %271 = vector.broadcast %cst_80 : f32 to vector<8x32xf32>
    %272 = arith.addf %271, %270 : vector<8x32xf32>
    %273 = arith.divf %271, %272 : vector<8x32xf32>
    %274 = arith.mulf %265, %242 : vector<8x32xf32>
    %275 = arith.mulf %259, %267 : vector<8x32xf32>
    %276 = arith.addf %274, %275 : vector<8x32xf32>
    %277 = math.tanh %276 : vector<8x32xf32>
    %278 = arith.mulf %273, %277 : vector<8x32xf32>
    %279 = arith.index_cast %248 : i32 to index
    %c0_81 = arith.constant 0 : index
    %280 = vector.load %arg6[%279, %c0_81] : memref<64x32xf32, #tpu.memory_space<vmem>>, vector<8x32xf32>
    tpu.vector_store %arg6[%279, %c0_81], %278 {strides = array<i32>} : memref<64x32xf32, #tpu.memory_space<vmem>>, vector<8x32xf32>,
    %c8_i32_82 = arith.constant 8 : i32
    %c0_83 = arith.constant 0 : index
    %c0_84 = arith.constant 0 : index
    %281 = vector.load %arg7[%c0_83, %c0_84] : memref<8x32xf32, #tpu.memory_space<vmem>>, vector<8x32xf32>
    tpu.vector_store %arg7[%c0_83, %c0_84], %278 {strides = array<i32>} : memref<8x32xf32, #tpu.memory_space<vmem>>, vector<8x32xf32>,
    %c0_85 = arith.constant 0 : index
    %c0_86 = arith.constant 0 : index
    %282 = vector.load %arg8[%c0_85, %c0_86] : memref<8x32xf32, #tpu.memory_space<vmem>>, vector<8x32xf32>
    tpu.vector_store %arg8[%c0_85, %c0_86], %276 {strides = array<i32>} : memref<8x32xf32, #tpu.memory_space<vmem>>, vector<8x32xf32>,
    return
  }
}

module attributes {stable_mosaic.version = 11 : i64} {
  func.func @_mdn_head_kernel(%arg0: i32, %arg1: memref<64x32xf32, #tpu.memory_space<vmem>>, %arg2: memref<32x384xf32, #tpu.memory_space<vmem>>, %arg3: memref<1x384xf32, #tpu.memory_space<vmem>>, %arg4: memref<64x384xf32, #tpu.memory_space<vmem>>) attributes {dimension_semantics = [#tpu.dimension_semantics<parallel>], iteration_bounds = array<i64: 1>, scalar_prefetch = 0 : i64, scratch_operands = 0 : i64, tpu.core_type = #tpu.core_type<tc>, window_params = [{transform_indices = @transform_0, window_bounds = array<i64: 64, 32>}, {pipeline_mode = #tpu.pipeline_mode<synchronous>, transform_indices = @transform_1, window_bounds = array<i64: 32, 384>}, {pipeline_mode = #tpu.pipeline_mode<synchronous>, transform_indices = @transform_2, window_bounds = array<i64: 1, 384>}, {transform_indices = @transform_3, window_bounds = array<i64: 64, 384>}]} {
    %c0 = arith.constant 0 : index
    %c0_0 = arith.constant 0 : index
    %0 = vector.load %arg1[%c0, %c0_0] : memref<64x32xf32, #tpu.memory_space<vmem>>, vector<64x32xf32>
    %c0_1 = arith.constant 0 : index
    %c0_2 = arith.constant 0 : index
    %1 = vector.load %arg2[%c0_1, %c0_2] : memref<32x384xf32, #tpu.memory_space<vmem>>, vector<32x384xf32>
    %cst = arith.constant dense<0.000000e+00> : vector<64x384xf32>
    %2 = tpu.matmul %0, %1, %cst {dimension_numbers = #tpu.dot_dimension_numbers<[1], [0], [0], [1], [0, 0, 1, 1], [], []>} : vector<64x32xf32>, vector<32x384xf32>, vector<64x384xf32> -> vector<64x384xf32>
    %c0_3 = arith.constant 0 : index
    %c0_4 = arith.constant 0 : index
    %3 = vector.load %arg3[%c0_3, %c0_4] : memref<1x384xf32, #tpu.memory_space<vmem>>, vector<1x384xf32>
    %4 = vector.broadcast %3 : vector<1x384xf32> to vector<64x384xf32>
    %5 = arith.addf %2, %4 : vector<64x384xf32>
    %6 = vector.extract_strided_slice %5 {offsets = [0, 0], sizes = [64, 128], strides = [1, 1]} : vector<64x384xf32> to vector<64x128xf32>
    %c0_5 = arith.constant 0 : index
    %c0_6 = arith.constant 0 : index
    %7 = vector.load %arg4[%c0_5, %c0_6] : memref<64x384xf32, #tpu.memory_space<vmem>>, vector<64x128xf32>
    tpu.vector_store %arg4[%c0_5, %c0_6], %6 {strides = array<i32>} : memref<64x384xf32, #tpu.memory_space<vmem>>, vector<64x128xf32>,
    %8 = vector.extract_strided_slice %5 {offsets = [0, 128], sizes = [64, 256], strides = [1, 1]} : vector<64x384xf32> to vector<64x256xf32>
    %9 = tpu.iota {dimensions = array<i32: 1>} : vector<64x256xi32>
    %c128_i32 = arith.constant 128 : i32
    %10 = vector.broadcast %c128_i32 : i32 to vector<64x256xi32>
    %11 = arith.addi %9, %10 : vector<64x256xi32>
    %c160_i32 = arith.constant 160 : i32
    %12 = vector.broadcast %c160_i32 : i32 to vector<64x256xi32>
    %13 = arith.cmpi slt, %11, %12 : vector<64x256xi32>
    %c320_i32 = arith.constant 320 : i32
    %14 = vector.broadcast %c320_i32 : i32 to vector<64x256xi32>
    %15 = arith.cmpi sge, %11, %14 : vector<64x256xi32>
    %c325_i32 = arith.constant 325 : i32
    %16 = vector.broadcast %c325_i32 : i32 to vector<64x256xi32>
    %17 = arith.cmpi slt, %11, %16 : vector<64x256xi32>
    %18 = arith.andi %15, %17 : vector<64x256xi1>
    %19 = vector.extract_strided_slice %5 {offsets = [0, 256], sizes = [64, 128], strides = [1, 1]} : vector<64x384xf32> to vector<64x128xf32>
    %20 = tpu.iota {dimensions = array<i32: 1>} : vector<64x128xi32>
    %c256_i32 = arith.constant 256 : i32
    %21 = vector.broadcast %c256_i32 : i32 to vector<64x128xi32>
    %22 = arith.addi %20, %21 : vector<64x128xi32>
    %c320_i32_7 = arith.constant 320 : i32
    %23 = vector.broadcast %c320_i32_7 : i32 to vector<64x128xi32>
    %24 = arith.cmpi sge, %22, %23 : vector<64x128xi32>
    %c325_i32_8 = arith.constant 325 : i32
    %25 = vector.broadcast %c325_i32_8 : i32 to vector<64x128xi32>
    %26 = arith.cmpi slt, %22, %25 : vector<64x128xi32>
    %27 = arith.andi %24, %26 : vector<64x128xi1>
    %cst_9 = arith.constant 0xFF800000 : f32
    %28 = vector.broadcast %cst_9 : f32 to vector<64x128xf32>
    %29 = arith.select %27, %19, %28 : vector<64x128xi1>, vector<64x128xf32>
    %cst_10 = arith.constant dense<0xFF800000> : vector<64xf32>
    %30 = vector.multi_reduction <maximumf>, %29, %cst_10 [1] : vector<64x128xf32> to vector<64xf32>
    %31 = vector.shape_cast %30 : vector<64xf32> to vector<64x1xf32>
    %cst_11 = arith.constant 0.000000e+00 : f32
    %32 = vector.shape_cast %31 : vector<64x1xf32> to vector<64x1xf32>
    %33 = vector.broadcast %32 : vector<64x1xf32> to vector<64x256xf32>
    %34 = vector.broadcast %cst_11 : f32 to vector<64x256xf32>
    %35 = arith.select %18, %33, %34 : vector<64x256xi1>, vector<64x256xf32>
    %36 = arith.subf %8, %35 : vector<64x256xf32>
    %37 = math.exp %36 : vector<64x256xf32>
    %38 = vector.extract_strided_slice %37 {offsets = [0, 128], sizes = [64, 128], strides = [1, 1]} : vector<64x256xf32> to vector<64x128xf32>
    %cst_12 = arith.constant 0.000000e+00 : f32
    %39 = vector.broadcast %cst_12 : f32 to vector<64x128xf32>
    %40 = arith.select %27, %38, %39 : vector<64x128xi1>, vector<64x128xf32>
    %cst_13 = arith.constant dense<0.000000e+00> : vector<64xf32>
    %41 = vector.multi_reduction <add>, %40, %cst_13 [1] : vector<64x128xf32> to vector<64xf32>
    %42 = vector.shape_cast %41 : vector<64xf32> to vector<64x1xf32>
    %cst_14 = arith.constant 1.000000e+00 : f32
    %43 = vector.broadcast %cst_14 : f32 to vector<64x1xf32>
    %44 = arith.divf %43, %42 : vector<64x1xf32>
    %45 = arith.select %13, %8, %37 : vector<64x256xi1>, vector<64x256xf32>
    %46 = vector.broadcast %44 : vector<64x1xf32> to vector<64x256xf32>
    %47 = arith.mulf %37, %46 : vector<64x256xf32>
    %48 = arith.select %18, %47, %45 : vector<64x256xi1>, vector<64x256xf32>
    %c0_15 = arith.constant 0 : index
    %c128 = arith.constant 128 : index
    %49 = vector.load %arg4[%c0_15, %c128] : memref<64x384xf32, #tpu.memory_space<vmem>>, vector<64x256xf32>
    tpu.vector_store %arg4[%c0_15, %c128], %48 {strides = array<i32>} : memref<64x384xf32, #tpu.memory_space<vmem>>, vector<64x256xf32>,
    return
  }
  func.func @transform_0(%arg0: i32) -> (i32, i32) {
    %c0_i32 = arith.constant 0 : i32
    %c0_i32_0 = arith.constant 0 : i32
    return %arg0, %c0_i32 : i32, i32
  }
  func.func @transform_1(%arg0: i32) -> (i32, i32) {
    %c0_i32 = arith.constant 0 : i32
    %c0_i32_0 = arith.constant 0 : i32
    %c0_i32_1 = arith.constant 0 : i32
    return %c0_i32, %c0_i32_0 : i32, i32
  }
  func.func @transform_2(%arg0: i32) -> (i32, i32) {
    %c0_i32 = arith.constant 0 : i32
    %c0_i32_0 = arith.constant 0 : i32
    %c0_i32_1 = arith.constant 0 : i32
    return %c0_i32, %c0_i32_0 : i32, i32
  }
  func.func @transform_3(%arg0: i32) -> (i32, i32) {
    %c0_i32 = arith.constant 0 : i32
    %c0_i32_0 = arith.constant 0 : i32
    return %arg0, %c0_i32 : i32, i32
  }
}

</mosaic_0001>

<bundles_post_ra>
// kernel: mdnrnn_forward.2
= control target key start
LH: loop header
LB: loop body
LE: loop exit
PB: predicated region body
PF: predicated region fallthrough
CT: control target
= control target key end

     0   :  { %vm68_vm0 = vcmask 1043456   ;;  %vm43_vm1 = vcmask 293888   ;;  %vm128_vm2 = vcmask 261120   ;;  %s836_s28 = smov 64   ;;  %s837_s9 = smov 32   ;;  %s1095_s1 = inlined_call_operand.vmem [shape: f32[36,128], index: 1, kind: input, shape index: {}]   ;;  %s1096_s3 = inlined_call_operand.vmem [shape: f32[1,128], index: 3, kind: input, shape index: {}]   ;;  %s1097_s0 = inlined_call_operand.vmem [shape: f32[64,36], index: 0, kind: input, shape index: {}]   ;;  %s1098_s2 = inlined_call_operand.vmem [shape: f32[32,128], index: 2, kind: input, shape index: {}]   ;;  %s1099_s4 = inlined_call_operand.vmem [shape: f32[8,32], index: 4, kind: input, shape index: {}, may-alias: {4,5}]   ;;  %s1100_s5 = inlined_call_operand.vmem [shape: f32[8,32], index: 5, kind: input, shape index: {}, may-alias: {4,5}]   ;;  %s1101_s6 = inlined_call_operand.vmem [shape: f32[64,32], index: 6, kind: output, shape index: {0}]   ;;  %s1102_s8 = inlined_call_operand.vmem [shape: f32[8,32], index: 8, kind: output, shape index: {2}]   ;;  %s1103_s7 = inlined_call_operand.vmem [shape: f32[8,32], index: 7, kind: output, shape index: {1}]  }
   0x1   :  { %v38_v0 = vld [vmem:[%s1095_s1 + $0x20] sm:$0xf]  ;;  %v37_v1 = vld [vmem:[%s1095_s1 + $0x18] sm:$0xff]  ;;  %v36_v2 = vld [vmem:[%s1095_s1 + $0x10] sm:$0xff] }
   0x2   :  { %753 = vmatpush.msk.msra.mxu1 %vm68_vm0, %v38_v0  ;;  %721 = vmatpush.msk.msra.mxu0 %vm68_vm0, %v38_v0  ;;  %v35_v3 = vld [vmem:[%s1095_s1 + $0x8] sm:$0xff]  ;;  %v34_v4 = vld [vmem:[%s1095_s1] sm:$0xff]  ;;  %v908_v7 = vld [vmem:[%s1098_s2 + $0x18] sm:$0xff] }
   0x3   :  { %754 = vmatpush.msk.msra.mxu2 %vm68_vm0, %v38_v0  ;;  %755 = vmatpush.msk.msra.mxu3 %vm68_vm0, %v38_v0  ;;  %v30_v5 = vld [vmem:[%s1097_s0 + $0x20] sm:$0xff]  ;;  %v914_v8 = vld [vmem:[%s1098_s2 + $0x10] sm:$0xff]  ;;  %v921_v9 = vld [vmem:[%s1098_s2 + $0x8] sm:$0xff] }
   0x4   :  { %756 = vmatpush.msra.mxu1 %v37_v1  ;;  %84 = vmatpush.msra.mxu0 %v37_v1  ;;  %v26_v6 = vld [vmem:[%s1097_s0] sm:$0xff]  ;;  %v31_v40 = vld [vmem:[%s1097_s0 + $0x28] sm:$0xff] }
   0x5   :  { %757 = vmatpush.msra.mxu2 %v37_v1  ;;  %758 = vmatpush.msra.mxu3 %v37_v1  ;;  %v929_v10 = vld [vmem:[%s1098_s2] sm:$0xff]  ;;  %v27_v43 = vld [vmem:[%s1097_s0 + $0x8] sm:$0xff] }
   0x6   :  { %759 = vmatpush.msra.mxu1 %v36_v2  ;;  %85 = vmatpush.msra.mxu0 %v36_v2  ;;  %v121_v11 = vld [vmem:[%s1099_s4] sm:$0xff] }
   0x7   :  { %760 = vmatpush.msra.mxu2 %v36_v2  ;;  %761 = vmatpush.msra.mxu3 %v36_v2  ;;  %v956_v14 = vld [vmem:[%s1096_s3] ss:$0 sm:$0xff]  ;;  %s838_s3 = smov 96  }
   0x8   :  { %762 = vmatpush.msra.mxu1 %v35_v3  ;;  %86 = vmatpush.msra.mxu0 %v35_v3  ;;  %v122_v19 = vld [vmem:[%s1100_s5] sm:$0xff] }
   0x9   :  { %763 = vmatpush.msra.mxu2 %v35_v3  ;;  %764 = vmatpush.msra.mxu3 %v35_v3 }
   0xa   :  { %765 = vmatpush.msra.mxu1 %v34_v4  ;;  %87 = vmatpush.msra.mxu0 %v34_v4 }
   0xb   :  { %726 = vmatmul.msk.f32.vlgmr.msra.gmra.mxu1 %vm43_vm1, %v30_v5  ;;  %722 = vmatmul.msk.f32.vlgmr.msra.gmra.mxu0 %vm43_vm1, %v26_v6  ;;  %v32_v6 = vld [vmem:[%s1097_s0 + $0x30] sm:$0xff] }
   0xc   :  { %144 = vmatpush.msrb.mxu1 %v908_v7  ;;  %766 = vmatpush.msra.mxu2 %v34_v4 }
   0xd   :  { %767 = vmatpush.msra.mxu3 %v34_v4  ;;  %727 = vmatmul.msk.f32.vlgmr.msra.gmra.mxu2 %vm43_vm1, %v31_v40  ;;  %v29_v40 = vld [vmem:[%s1097_s0 + $0x18] sm:$0xff] }
   0xe   :  { %219 = vmatpush.msrb.mxu2 %v908_v7  ;;  %145 = vmatpush.msrb.mxu1 %v914_v8 }
   0xf   :  { %291 = vmatpush.msrb.mxu3 %v908_v7 }
  0x10   :  { %220 = vmatpush.msrb.mxu2 %v914_v8  ;;  %146 = vmatpush.msrb.mxu1 %v921_v9 }
  0x11   :  { %292 = vmatpush.msrb.mxu3 %v914_v8 }
  0x12   :  { %221 = vmatpush.msrb.mxu2 %v921_v9  ;;  %147 = vmatpush.msrb.mxu1 %v929_v10 }
  0x13   :  { %293 = vmatpush.msrb.mxu3 %v921_v9  ;;  %730 = vmatmul.msk.f32.vlgmr.msrb.gmra.mxu1 %vm128_vm2, %v121_v11  ;;  %v33_v11 = vld [vmem:[%s1097_s0 + $0x38] sm:$0xff] }
  0x14   :  { %222 = vmatpush.msrb.mxu2 %v929_v10  ;;  %363 = vmatpush.msra.mxu1 %v908_v7 }
  0x15   :  { %294 = vmatpush.msrb.mxu3 %v929_v10  ;;  %723 = vmatmul.msk.f32.gmra.mxu0 %vm43_vm1, %v27_v43 }
  0x16   :  { %364 = vmatpush.msra.mxu1 %v914_v8  ;;  %435 = vmatpush.msra.mxu2 %v908_v7 }
  0x17   :  { %728 = vmatmul.msk.f32.vlgmr.msra.gmra.mxu3 %vm43_vm1, %v32_v6 }
  0x18   :  { %365 = vmatpush.msra.mxu1 %v921_v9  ;;  %436 = vmatpush.msra.mxu2 %v914_v8 }
  0x19   :  { %507 = vmatpush.msra.mxu3 %v908_v7 }
  0x1a   :  { %366 = vmatpush.msra.mxu1 %v929_v10  ;;  %437 = vmatpush.msra.mxu2 %v921_v9 }
  0x1b   :  { %508 = vmatpush.msra.mxu3 %v914_v8 }
  0x1c   :  { %579 = vmatpush.msrb.mxu1 %v908_v7  ;;  %438 = vmatpush.msra.mxu2 %v929_v10 }
  0x1d   :  { %509 = vmatpush.msra.mxu3 %v921_v9 }
  0x1e   :  { %580 = vmatpush.msrb.mxu1 %v914_v8 }
  0x1f   :  { %510 = vmatpush.msra.mxu3 %v929_v10 }
  0x20   :  { %581 = vmatpush.msrb.mxu1 %v921_v9  ;;  %729 = vmatmul.msk.f32.gmra.mxu3 %vm43_vm1, %v33_v11 }
  0x22   :  { %582 = vmatpush.msrb.mxu1 %v929_v10 }
  0x88   :  { %v951_v12 = vpop.f32.mrf.mxu1  ;;  %v89_v13 = vpop.f32.mrf.mxu0 }
  0x89   :  { %v90_v15 = vadd.f32 %v956_v14, %v89_v13 }
  0x90   :  { %v149_v16 = vpop.f32.mrf.mxu1  ;;  %v988_v45 = vpop.f32.mrf.mxu2 }
  0x91   :  { %v152_v17 = vadd.f32 %v149_v16, %v90_v15 }
  0x92   :  { %v92_v46 = vpop.f32.mrf.mxu0 }
  0x93   :  { %772 = vtanh.f32 %v152_v17  ;;  %v731_v20 = vmul.f32 -1.442695, %v152_v17  ;;  %v93_v47 = vadd.f32 %v956_v14, %v92_v46 }
  0x95   :  { %774 = vpow2.f32 %v731_v20 }
  0x99   :  { %v773_v18 = vpop.eup %772 }
  0x9a   :  { %179 = vrot.lane.b32.xlu0 %v773_v18, %s836_s28 }
  0x9b   :  { %v775_v21 = vpop.eup %774 }
  0x9c   :  { %v156_v22 = vadd.f32 1.0, %v775_v21 }
  0x9e   :  { %776 = vrcp.f32 %v156_v22  ;;  %v168_v28 = vand.u32 2147483648, %v156_v22  ;;  %vm162_vm4 = vweird.f32 %v156_v22  ;;  %v166_v29 = vand.u32 2147483647, %v156_v22 }
  0xa0   :  { %v169_v31 = vor.u32 1.1754944e-38, %v168_v28  ;;  %vm167_vm6 = vcmp.eq.f32.partialorder %v166_v29, 8.507059e+37 }
  0xa2   :  { %174 = vrot.lane.b32.xlu0 %v122_v19, %s837_s9 }
  0xa4   :  { %v777_v23 = vpop.eup %776 }
  0xa5   :  { %v158_v24 = vmul.f32 %v777_v23, %v156_v22  ;;  %vm163_vm3 = vweird.f32 %v777_v23 }
  0xa6   :  { %vm164_vm5 = vmor %vm162_vm4, %vm163_vm3 }
  0xa7   :  { %v159_v25 = vsub.f32 1.0, %v158_v24 }
  0xa9   :  { %v160_v26 = vmul.f32 %v777_v23, %v159_v25 }
  0xab   :  { %v161_v27 = vadd.f32 %v777_v23, %v160_v26 }
  0xad   :  { %v165_v30 = vsel %vm164_vm5, %v777_v23, %v161_v27 }
  0xae   :  { %v170_v33 = vsel %vm167_vm6, %v169_v31, %v165_v30 }
 0x10c   :  { %v180_v32 = vpop.permute.xlu0 %179 }
 0x10d   :  { %v182_v34 = vmul.f32 %v180_v32, %v170_v33 }
 0x10f   :  { %184 = vrot.lane.b32.xlu1 %v182_v34, %s837_s9 }
 0x114   :  { %v175_v35 = vpop.permute.xlu0 %174 }
 0x115   :  { %v177_v36 = vmul.f32 %v175_v35, %v170_v33 }
 0x181   :  { %v185_v37 = vpop.permute.xlu1 %184 }
 0x182   :  { %v187_v38 = vadd.f32 %v185_v37, %v177_v36 }
 0x184   :  { %778 = vtanh.f32 %v187_v38 }
 0x18a   :  { %v779_v39 = vpop.eup %778 }
 0x18b   :  { %190 = vrot.lane.b32.xlu1 %v779_v39, %s836_s28 }
 0x1fd   :  { %v191_v41 = vpop.permute.xlu1 %190 }
 0x1fe   :  { %v193_v42 = vmul.f32 %v191_v41, %v170_v33 }
 0x200   :  { %195 = vrot.lane.b32.xlu2 %v193_v42, %s837_s9 }
 0x25a   :  { %v196_v44 = vpop.permute.xlu2 %195 }
 0x25b   :  { %198 = vst.msk [vmem:[%s1101_s6] sm:$0xff] %vm128_vm2, %v196_v44  ;;  %732 = vmatmul.msk.f32.vlgmr.msrb.gmra.mxu2 %vm128_vm2, %v196_v44 }
 0x25c   :  { %651 = vmatpush.msrb.mxu2 %v908_v7  ;;  %v28_v7 = vld [vmem:[%s1097_s0 + $0x10] sm:$0xff] }
 0x25d   :  { %724 = vmatmul.msk.f32.gmra.mxu0 %vm43_vm1, %v28_v7 }
 0x25e   :  { %652 = vmatpush.msrb.mxu2 %v914_v8 }
 0x260   :  { %653 = vmatpush.msrb.mxu2 %v921_v9  ;;  %v1016_v9 = vpop.f32.mrf.mxu3 }
 0x262   :  { %654 = vmatpush.msrb.mxu2 %v929_v10 }
 0x265   :  { %725 = vmatmul.msk.f32.gmra.mxu0 %vm43_vm1, %v29_v40 }
 0x268   :  { %v1018_v10 = vpop.f32.mrf.mxu3 }
 0x2da   :  { %v95_v16 = vpop.f32.mrf.mxu0 }
 0x2db   :  { %v96_v17 = vadd.f32 %v956_v14, %v95_v16 }
 0x2de   :  { %v224_v48 = vpop.f32.mrf.mxu2 }
 0x2df   :  { %v227_v49 = vadd.f32 %v224_v48, %v93_v47 }
 0x2e1   :  { %780 = vtanh.f32 %v227_v49  ;;  %v733_v51 = vmul.f32 -1.442695, %v227_v49 }
 0x2e2   :  { %v98_v44 = vpop.f32.mrf.mxu0 }
 0x2e3   :  { %782 = vpow2.f32 %v733_v51  ;;  %v99_v46 = vadd.f32 %v956_v14, %v98_v44 }
 0x2e7   :  { %v781_v50 = vpop.eup %780 }
 0x2e8   :  { %250 = vrot.lane.b32.xlu2 %v781_v50, %s836_s28 }
 0x2e9   :  { %v783_v52 = vpop.eup %782 }
 0x2ea   :  { %v231_v53 = vadd.f32 1.0, %v783_v52 }
 0x2ec   :  { %784 = vrcp.f32 %v231_v53  ;;  %v243_v59 = vand.u32 2147483648, %v231_v53  ;;  %vm237_vm8 = vweird.f32 %v231_v53  ;;  %v241_v60 = vand.u32 2147483647, %v231_v53 }
 0x2ee   :  { %v244_v62 = vor.u32 1.1754944e-38, %v243_v59  ;;  %vm242_vm10 = vcmp.eq.f32.partialorder %v241_v60, 8.507059e+37 }
 0x2f2   :  { %v785_v54 = vpop.eup %784 }
 0x2f3   :  { %v233_v55 = vmul.f32 %v785_v54, %v231_v53  ;;  %vm238_vm7 = vweird.f32 %v785_v54 }
 0x2f4   :  { %vm239_vm9 = vmor %vm237_vm8, %vm238_vm7 }
 0x2f5   :  { %v234_v56 = vsub.f32 1.0, %v233_v55 }
 0x2f7   :  { %v235_v57 = vmul.f32 %v785_v54, %v234_v56 }
 0x2f9   :  { %v236_v58 = vadd.f32 %v785_v54, %v235_v57 }
 0x2fb   :  { %v240_v61 = vsel %vm239_vm9, %v785_v54, %v236_v58 }
 0x2fc   :  { %v245_v0 = vsel %vm242_vm10, %v244_v62, %v240_v61 }
 0x2fd   :  { %v248_v2 = vmul.f32 %v245_v0, %v187_v38 }
 0x342   :  { %v251_v63 = vpop.permute.xlu2 %250 }
 0x343   :  { %v253_v1 = vmul.f32 %v251_v63, %v245_v0 }
 0x345   :  { %255 = vrot.lane.b32.xlu0 %v253_v1, %s837_s9 }
 0x3b7   :  { %v256_v3 = vpop.permute.xlu0 %255 }
 0x3b8   :  { %v258_v4 = vadd.f32 %v256_v3, %v248_v2 }
 0x3ba   :  { %786 = vtanh.f32 %v258_v4 }
 0x3c0   :  { %v787_v5 = vpop.eup %786 }
 0x3c1   :  { %261 = vrot.lane.b32.xlu1 %v787_v5, %s836_s28 }
 0x433   :  { %v262_v13 = vpop.permute.xlu1 %261 }
 0x434   :  { %v264_v15 = vmul.f32 %v262_v13, %v245_v0  ;;  %v102_v13 = vadd.f32 %v956_v14, %v951_v12 }
 0x436   :  { %266 = vrot.lane.b32.xlu2 %v264_v15, %s837_s9 }
 0x490   :  { %v267_v8 = vpop.permute.xlu2 %266 }
 0x491   :  { %734 = vst.msk [vmem:[%s1101_s6 + $0x8] sm:$0xff] %vm128_vm2, %v267_v8  ;;  %735 = vmatmul.msk.f32.vlgmr.msrb.gmra.mxu3 %vm128_vm2, %v267_v8 }
 0x514   :  { %v296_v18 = vpop.f32.mrf.mxu3 }
 0x515   :  { %v299_v19 = vadd.f32 %v296_v18, %v96_v17 }
 0x517   :  { %788 = vtanh.f32 %v299_v19  ;;  %v736_v21 = vmul.f32 -1.442695, %v299_v19 }
 0x519   :  { %790 = vpow2.f32 %v736_v21 }
 0x51d   :  { %v789_v20 = vpop.eup %788 }
 0x51e   :  { %322 = vrot.lane.b32.xlu0 %v789_v20, %s836_s28 }
 0x51f   :  { %v791_v22 = vpop.eup %790 }
 0x520   :  { %v303_v23 = vadd.f32 1.0, %v791_v22 }
 0x522   :  { %792 = vrcp.f32 %v303_v23  ;;  %v315_v29 = vand.u32 2147483648, %v303_v23  ;;  %vm309_vm12 = vweird.f32 %v303_v23  ;;  %v313_v30 = vand.u32 2147483647, %v303_v23 }
 0x524   :  { %v316_v32 = vor.u32 1.1754944e-38, %v315_v29  ;;  %vm314_vm14 = vcmp.eq.f32.partialorder %v313_v30, 8.507059e+37 }
 0x528   :  { %v793_v24 = vpop.eup %792 }
 0x529   :  { %v305_v25 = vmul.f32 %v793_v24, %v303_v23  ;;  %vm310_vm11 = vweird.f32 %v793_v24 }
 0x52a   :  { %vm311_vm13 = vmor %vm309_vm12, %vm310_vm11 }
 0x52b   :  { %v306_v26 = vsub.f32 1.0, %v305_v25 }
 0x52d   :  { %v307_v27 = vmul.f32 %v793_v24, %v306_v26 }
 0x52f   :  { %v308_v28 = vadd.f32 %v793_v24, %v307_v27 }
 0x531   :  { %v312_v31 = vsel %vm311_vm13, %v793_v24, %v308_v28 }
 0x532   :  { %v317_v34 = vsel %vm314_vm14, %v316_v32, %v312_v31 }
 0x533   :  { %v320_v36 = vmul.f32 %v317_v34, %v258_v4 }
 0x590   :  { %v323_v33 = vpop.permute.xlu0 %322 }
 0x591   :  { %v325_v35 = vmul.f32 %v323_v33, %v317_v34 }
 0x593   :  { %327 = vrot.lane.b32.xlu1 %v325_v35, %s837_s9 }
 0x605   :  { %v328_v37 = vpop.permute.xlu1 %327 }
 0x606   :  { %v330_v38 = vadd.f32 %v328_v37, %v320_v36  ;;  %v105_v37 = vadd.f32 %v956_v14, %v988_v45 }
 0x608   :  { %794 = vtanh.f32 %v330_v38 }
 0x60e   :  { %v795_v39 = vpop.eup %794 }
 0x60f   :  { %333 = vrot.lane.b32.xlu2 %v795_v39, %s836_s28 }
 0x669   :  { %v334_v41 = vpop.permute.xlu2 %333 }
 0x66a   :  { %v336_v42 = vmul.f32 %v334_v41, %v317_v34 }
 0x66c   :  { %338 = vrot.lane.b32.xlu0 %v336_v42, %s837_s9 }
 0x6de   :  { %v339_v43 = vpop.permute.xlu0 %338 }
 0x6df   :  { %737 = vst.msk [vmem:[%s1101_s6 + $0x10] sm:$0xff] %vm128_vm2, %v339_v43  ;;  %738 = vmatmul.msk.f32.vlgmr.msra.gmra.mxu1 %vm128_vm2, %v339_v43 }
 0x75c   :  { %v368_v47 = vpop.f32.mrf.mxu1 }
 0x75d   :  { %v371_v48 = vadd.f32 %v368_v47, %v99_v46 }
 0x75f   :  { %796 = vtanh.f32 %v371_v48  ;;  %v739_v50 = vmul.f32 -1.442695, %v371_v48 }
 0x761   :  { %798 = vpow2.f32 %v739_v50 }
 0x765   :  { %v797_v49 = vpop.eup %796 }
 0x766   :  { %394 = vrot.lane.b32.xlu1 %v797_v49, %s836_s28 }
 0x767   :  { %v799_v51 = vpop.eup %798 }
 0x768   :  { %v375_v52 = vadd.f32 1.0, %v799_v51 }
 0x76a   :  { %800 = vrcp.f32 %v375_v52  ;;  %v387_v58 = vand.u32 2147483648, %v375_v52  ;;  %vm381_vm0 = vweird.f32 %v375_v52  ;;  %v385_v59 = vand.u32 2147483647, %v375_v52 }
 0x76c   :  { %v388_v61 = vor.u32 1.1754944e-38, %v387_v58  ;;  %vm386_vm3 = vcmp.eq.f32.partialorder %v385_v59, 8.507059e+37 }
 0x770   :  { %v801_v53 = vpop.eup %800 }
 0x771   :  { %v377_v54 = vmul.f32 %v801_v53, %v375_v52  ;;  %vm382_vm15 = vweird.f32 %v801_v53 }
 0x772   :  { %vm383_vm1 = vmor %vm381_vm0, %vm382_vm15 }
 0x773   :  { %v378_v55 = vsub.f32 1.0, %v377_v54 }
 0x775   :  { %v379_v56 = vmul.f32 %v801_v53, %v378_v55 }
 0x777   :  { %v380_v57 = vadd.f32 %v801_v53, %v379_v56 }
 0x779   :  { %v384_v60 = vsel %vm383_vm1, %v801_v53, %v380_v57 }
 0x77a   :  { %v389_v63 = vsel %vm386_vm3, %v388_v61, %v384_v60 }
 0x77b   :  { %v392_v1 = vmul.f32 %v389_v63, %v330_v38 }
 0x7d8   :  { %v395_v62 = vpop.permute.xlu1 %394 }
 0x7d9   :  { %v397_v0 = vmul.f32 %v395_v62, %v389_v63 }
 0x7db   :  { %399 = vrot.lane.b32.xlu2 %v397_v0, %s837_s9 }
 0x835   :  { %v400_v2 = vpop.permute.xlu2 %399 }
 0x836   :  { %v402_v3 = vadd.f32 %v400_v2, %v392_v1 }
 0x838   :  { %802 = vtanh.f32 %v402_v3 }
 0x83e   :  { %v803_v4 = vpop.eup %802 }
 0x83f   :  { %405 = vrot.lane.b32.xlu0 %v803_v4, %s836_s28 }
 0x8b1   :  { %v406_v5 = vpop.permute.xlu0 %405 }
 0x8b2   :  { %v408_v6 = vmul.f32 %v406_v5, %v389_v63  ;;  %v108_v63 = vadd.f32 %v956_v14, %v1016_v9 }
 0x8b4   :  { %410 = vrot.lane.b32.xlu1 %v408_v6, %s837_s9 }
 0x926   :  { %v411_v11 = vpop.permute.xlu1 %410 }
 0x927   :  { %740 = vst.msk [vmem:[%s1101_s6 + $0x18] sm:$0xff] %vm128_vm2, %v411_v11  ;;  %741 = vmatmul.msk.f32.vlgmr.msra.gmra.mxu2 %vm128_vm2, %v411_v11 }
 0x9aa   :  { %v440_v15 = vpop.f32.mrf.mxu2 }
 0x9ab   :  { %v443_v7 = vadd.f32 %v440_v15, %v102_v13 }
 0x9ad   :  { %804 = vtanh.f32 %v443_v7  ;;  %v742_v16 = vmul.f32 -1.442695, %v443_v7 }
 0x9af   :  { %806 = vpow2.f32 %v742_v16 }
 0x9b3   :  { %v805_v8 = vpop.eup %804 }
 0x9b4   :  { %466 = vrot.lane.b32.xlu2 %v805_v8, %s836_s28 }
 0x9b5   :  { %v807_v17 = vpop.eup %806 }
 0x9b6   :  { %v447_v18 = vadd.f32 1.0, %v807_v17 }
 0x9b8   :  { %808 = vrcp.f32 %v447_v18  ;;  %v459_v24 = vand.u32 2147483648, %v447_v18  ;;  %vm453_vm5 = vweird.f32 %v447_v18  ;;  %v457_v12 = vand.u32 2147483647, %v447_v18 }
 0x9ba   :  { %v460_v26 = vor.u32 1.1754944e-38, %v459_v24  ;;  %vm458_vm7 = vcmp.eq.f32.partialorder %v457_v12, 8.507059e+37 }
 0x9be   :  { %v809_v19 = vpop.eup %808 }
 0x9bf   :  { %v449_v20 = vmul.f32 %v809_v19, %v447_v18  ;;  %vm454_vm4 = vweird.f32 %v809_v19 }
 0x9c0   :  { %vm455_vm6 = vmor %vm453_vm5, %vm454_vm4 }
 0x9c1   :  { %v450_v21 = vsub.f32 1.0, %v449_v20 }
 0x9c3   :  { %v451_v22 = vmul.f32 %v809_v19, %v450_v21 }
 0x9c5   :  { %v452_v23 = vadd.f32 %v809_v19, %v451_v22 }
 0x9c7   :  { %v456_v25 = vsel %vm455_vm6, %v809_v19, %v452_v23 }
 0x9c8   :  { %v461_v28 = vsel %vm458_vm7, %v460_v26, %v456_v25 }
 0x9c9   :  { %v464_v30 = vmul.f32 %v461_v28, %v402_v3 }
 0xa0e   :  { %v467_v27 = vpop.permute.xlu2 %466 }
 0xa0f   :  { %v469_v29 = vmul.f32 %v467_v27, %v461_v28  ;;  %v111_v27 = vadd.f32 %v956_v14, %v1018_v10 }
 0xa11   :  { %471 = vrot.lane.b32.xlu0 %v469_v29, %s837_s9 }
 0xa83   :  { %v472_v31 = vpop.permute.xlu0 %471 }
 0xa84   :  { %v474_v32 = vadd.f32 %v472_v31, %v464_v30 }
 0xa86   :  { %810 = vtanh.f32 %v474_v32 }
 0xa8c   :  { %v811_v33 = vpop.eup %810 }
 0xa8d   :  { %477 = vrot.lane.b32.xlu1 %v811_v33, %s836_s28 }
 0xaff   :  { %v478_v34 = vpop.permute.xlu1 %477 }
 0xb00   :  { %v480_v35 = vmul.f32 %v478_v34, %v461_v28 }
 0xb02   :  { %482 = vrot.lane.b32.xlu2 %v480_v35, %s837_s9 }
 0xb5c   :  { %v483_v36 = vpop.permute.xlu2 %482 }
 0xb5d   :  { %743 = vst.msk [vmem:[%s1101_s6 + $0x20] sm:$0xff] %vm128_vm2, %v483_v36  ;;  %744 = vmatmul.msk.f32.vlgmr.msra.gmra.mxu3 %vm128_vm2, %v483_v36 }
 0xbe0   :  { %v512_v38 = vpop.f32.mrf.mxu3 }
 0xbe1   :  { %v515_v39 = vadd.f32 %v512_v38, %v105_v37 }
 0xbe3   :  { %812 = vtanh.f32 %v515_v39  ;;  %v745_v41 = vmul.f32 -1.442695, %v515_v39 }
 0xbe5   :  { %814 = vpow2.f32 %v745_v41 }
 0xbe9   :  { %v813_v40 = vpop.eup %812 }
 0xbea   :  { %538 = vrot.lane.b32.xlu0 %v813_v40, %s836_s28 }
 0xbeb   :  { %v815_v42 = vpop.eup %814 }
 0xbec   :  { %v519_v43 = vadd.f32 1.0, %v815_v42 }
 0xbee   :  { %816 = vrcp.f32 %v519_v43  ;;  %v531_v50 = vand.u32 2147483648, %v519_v43  ;;  %vm525_vm9 = vweird.f32 %v519_v43  ;;  %v529_v45 = vand.u32 2147483647, %v519_v43 }
 0xbf0   :  { %v532_v52 = vor.u32 1.1754944e-38, %v531_v50  ;;  %vm530_vm11 = vcmp.eq.f32.partialorder %v529_v45, 8.507059e+37 }
 0xbf4   :  { %v817_v44 = vpop.eup %816 }
 0xbf5   :  { %v521_v46 = vmul.f32 %v817_v44, %v519_v43  ;;  %vm526_vm8 = vweird.f32 %v817_v44 }
 0xbf6   :  { %vm527_vm10 = vmor %vm525_vm9, %vm526_vm8 }
 0xbf7   :  { %v522_v47 = vsub.f32 1.0, %v521_v46 }
 0xbf9   :  { %v523_v48 = vmul.f32 %v817_v44, %v522_v47 }
 0xbfb   :  { %v524_v49 = vadd.f32 %v817_v44, %v523_v48 }
 0xbfd   :  { %v528_v51 = vsel %vm527_vm10, %v817_v44, %v524_v49 }
 0xbfe   :  { %v533_v54 = vsel %vm530_vm11, %v532_v52, %v528_v51 }
 0xbff   :  { %v536_v56 = vmul.f32 %v533_v54, %v474_v32 }
 0xc5c   :  { %v539_v53 = vpop.permute.xlu0 %538 }
 0xc5d   :  { %v541_v55 = vmul.f32 %v539_v53, %v533_v54 }
 0xc5f   :  { %543 = vrot.lane.b32.xlu1 %v541_v55, %s837_s9 }
 0xcd1   :  { %v544_v57 = vpop.permute.xlu1 %543 }
 0xcd2   :  { %v546_v58 = vadd.f32 %v544_v57, %v536_v56 }
 0xcd4   :  { %818 = vtanh.f32 %v546_v58 }
 0xcda   :  { %v819_v59 = vpop.eup %818 }
 0xcdb   :  { %549 = vrot.lane.b32.xlu2 %v819_v59, %s836_s28 }
 0xd35   :  { %v550_v60 = vpop.permute.xlu2 %549 }
 0xd36   :  { %v552_v61 = vmul.f32 %v550_v60, %v533_v54 }
 0xd38   :  { %554 = vrot.lane.b32.xlu0 %v552_v61, %s837_s9 }
 0xdaa   :  { %v555_v62 = vpop.permute.xlu0 %554 }
 0xdab   :  { %746 = vst.msk [vmem:[%s1101_s6 + $0x28] sm:$0xff] %vm128_vm2, %v555_v62  ;;  %747 = vmatmul.msk.f32.vlgmr.msrb.gmra.mxu1 %vm128_vm2, %v555_v62 }
 0xe28   :  { %v584_v0 = vpop.f32.mrf.mxu1 }
 0xe29   :  { %v587_v1 = vadd.f32 %v584_v0, %v108_v63 }
 0xe2b   :  { %820 = vtanh.f32 %v587_v1  ;;  %v748_v3 = vmul.f32 -1.442695, %v587_v1 }
 0xe2d   :  { %822 = vpow2.f32 %v748_v3 }
 0xe31   :  { %v821_v2 = vpop.eup %820 }
 0xe32   :  { %610 = vrot.lane.b32.xlu1 %v821_v2, %s836_s28 }
 0xe33   :  { %v823_v4 = vpop.eup %822 }
 0xe34   :  { %v591_v5 = vadd.f32 1.0, %v823_v4 }
 0xe36   :  { %824 = vrcp.f32 %v591_v5  ;;  %v603_v8 = vand.u32 2147483648, %v591_v5  ;;  %vm597_vm13 = vweird.f32 %v591_v5  ;;  %v601_v9 = vand.u32 2147483647, %v591_v5 }
 0xe38   :  { %v604_v17 = vor.u32 1.1754944e-38, %v603_v8  ;;  %vm602_vm15 = vcmp.eq.f32.partialorder %v601_v9, 8.507059e+37 }
 0xe3c   :  { %v825_v6 = vpop.eup %824 }
 0xe3d   :  { %v593_v11 = vmul.f32 %v825_v6, %v591_v5  ;;  %vm598_vm12 = vweird.f32 %v825_v6 }
 0xe3e   :  { %vm599_vm14 = vmor %vm597_vm13, %vm598_vm12 }
 0xe3f   :  { %v594_v13 = vsub.f32 1.0, %v593_v11 }
 0xe41   :  { %v595_v15 = vmul.f32 %v825_v6, %v594_v13 }
 0xe43   :  { %v596_v7 = vadd.f32 %v825_v6, %v595_v15 }
 0xe45   :  { %v600_v16 = vsel %vm599_vm14, %v825_v6, %v596_v7 }
 0xe46   :  { %v605_v19 = vsel %vm602_vm15, %v604_v17, %v600_v16 }
 0xe47   :  { %v608_v21 = vmul.f32 %v605_v19, %v546_v58 }
 0xea4   :  { %v611_v18 = vpop.permute.xlu1 %610 }
 0xea5   :  { %v613_v20 = vmul.f32 %v611_v18, %v605_v19 }
 0xea7   :  { %615 = vrot.lane.b32.xlu2 %v613_v20, %s837_s9 }
 0xf01   :  { %v616_v22 = vpop.permute.xlu2 %615 }
 0xf02   :  { %v618_v23 = vadd.f32 %v616_v22, %v608_v21 }
 0xf04   :  { %826 = vtanh.f32 %v618_v23 }
 0xf0a   :  { %v827_v24 = vpop.eup %826 }
 0xf0b   :  { %621 = vrot.lane.b32.xlu0 %v827_v24, %s836_s28 }
 0xf7d   :  { %v622_v12 = vpop.permute.xlu0 %621 }
 0xf7e   :  { %v624_v25 = vmul.f32 %v622_v12, %v605_v19 }
 0xf80   :  { %626 = vrot.lane.b32.xlu1 %v624_v25, %s837_s9 }
 0xff2   :  { %v627_v26 = vpop.permute.xlu1 %626 }
 0xff3   :  { %749 = vst.msk [vmem:[%s1101_s6 + $0x30] sm:$0xff] %vm128_vm2, %v627_v26  ;;  %750 = vmatmul.msk.f32.vlgmr.msrb.gmra.mxu2 %vm128_vm2, %v627_v26 }
0x1076   :  { %v656_v28 = vpop.f32.mrf.mxu2 }
0x1077   :  { %v659_v29 = vadd.f32 %v656_v28, %v111_v27 }
0x1079   :  { %828 = vtanh.f32 %v659_v29  ;;  %v751_v31 = vmul.f32 -1.442695, %v659_v29 }
0x107b   :  { %830 = vpow2.f32 %v751_v31 }
0x107f   :  { %v829_v30 = vpop.eup %828 }
0x1080   :  { %682 = vrot.lane.b32.xlu2 %v829_v30, %s836_s28 }
0x1081   :  { %v831_v32 = vpop.eup %830 }
0x1082   :  { %v663_v33 = vadd.f32 1.0, %v831_v32 }
0x1084   :  { %832 = vrcp.f32 %v663_v33  ;;  %v675_v39 = vand.u32 2147483648, %v663_v33  ;;  %vm669_vm1 = vweird.f32 %v663_v33  ;;  %v673_v14 = vand.u32 2147483647, %v663_v33 }
0x1086   :  { %v676_v40 = vor.u32 1.1754944e-38, %v675_v39  ;;  %vm674_vm4 = vcmp.eq.f32.partialorder %v673_v14, 8.507059e+37 }
0x108a   :  { %v833_v34 = vpop.eup %832 }
0x108b   :  { %v665_v35 = vmul.f32 %v833_v34, %v663_v33  ;;  %vm670_vm0 = vweird.f32 %v833_v34 }
0x108c   :  { %vm671_vm3 = vmor %vm669_vm1, %vm670_vm0 }
0x108d   :  { %v666_v36 = vsub.f32 1.0, %v665_v35 }
0x108f   :  { %v667_v37 = vmul.f32 %v833_v34, %v666_v36 }
0x1091   :  { %v668_v38 = vadd.f32 %v833_v34, %v667_v37 }
0x1093   :  { %v672_v10 = vsel %vm671_vm3, %v833_v34, %v668_v38 }
0x1094   :  { %v677_v42 = vsel %vm674_vm4, %v676_v40, %v672_v10 }
0x1095   :  { %v680_v44 = vmul.f32 %v677_v42, %v618_v23 }
0x10da   :  { %v683_v41 = vpop.permute.xlu2 %682 }
0x10db   :  { %v685_v43 = vmul.f32 %v683_v41, %v677_v42 }
0x10dd   :  { %687 = vrot.lane.b32.xlu0 %v685_v43, %s837_s9 }
0x114f   :  { %v688_v46 = vpop.permute.xlu0 %687 }
0x1150   :  { %v690_v47 = vadd.f32 %v688_v46, %v680_v44 }
0x1152   :  { %834 = vtanh.f32 %v690_v47  ;;  %705 = vrot.lane.b32.xlu0 %v690_v47, %s838_s3 }
0x1158   :  { %v835_v48 = vpop.eup %834 }
0x1159   :  { %693 = vrot.lane.b32.xlu1 %v835_v48, %s836_s28 }
0x11c4   :  { %v706_v49 = vpop.permute.xlu0 %705 }
0x11c5   :  { %708 = vst.msk [vmem:[%s1102_s8] sm:$0xff] %vm128_vm2, %v706_v49 }
0x11cb   :  { %v694_v50 = vpop.permute.xlu1 %693 }
0x11cc   :  { %v696_v45 = vmul.f32 %v694_v50, %v677_v42 }
0x11ce   :  { %698 = vrot.lane.b32.xlu2 %v696_v45, %s837_s9 }
0x1228   :  { %v699_v51 = vpop.permute.xlu2 %698 }
0x1229   :  { %752 = vst.msk [vmem:[%s1101_s6 + $0x38] sm:$0xff] %vm128_vm2, %v699_v51 }
0x122a   :  { %703 = vst.msk [vmem:[%s1103_s7] sm:$0xff] %vm128_vm2, %v699_v51 }

// kernel: mdnrnn_forward.3
= control target key start
LH: loop header
LB: loop body
LE: loop exit
PB: predicated region body
PF: predicated region fallthrough
CT: control target
= control target key end

     0   :  { %vm42_vm0 = vcmask 261120   ;;  %v198_v20 = vlaneseq  ;;  %s944_s1 = inlined_call_operand.vmem [shape: f32[32,384], index: 1, kind: input, shape index: {}]   ;;  %s945_s0 = inlined_call_operand.vmem [shape: f32[64,32], index: 0, kind: input, shape index: {}]   ;;  %s946_s2 = inlined_call_operand.vmem [shape: f32[1,384], index: 2, kind: input, shape index: {}]   ;;  %s947_s3 = inlined_call_operand.vmem [shape: f32[64,384], index: 3, kind: output, shape index: {}]  }
   0x1   :  { %v31_v0 = vld [vmem:[%s944_s1 + $0x48] sm:$0xff]  ;;  %v33_v1 = vld [vmem:[%s944_s1 + $0x58] sm:$0xff]  ;;  %v28_v2 = vld [vmem:[%s944_s1 + $0x30] sm:$0xff] }
   0x2   :  { %538 = vmatpush.msra.mxu3 %v31_v0  ;;  %161 = vmatpush.msra.mxu2 %v33_v1  ;;  %v30_v3 = vld [vmem:[%s944_s1 + $0x40] sm:$0xff]  ;;  %v25_v4 = vld [vmem:[%s944_s1 + $0x18] sm:$0xff]  ;;  %v27_v5 = vld [vmem:[%s944_s1 + $0x28] sm:$0xff]  ;;  %v199_v21 = vand.u32 127, %v198_v20 }
   0x3   :  { %79 = vmatpush.msra.mxu0 %v31_v0  ;;  %v32_v6 = vld [vmem:[%s944_s1 + $0x50] sm:$0xff]  ;;  %v22_v7 = vld [vmem:[%s944_s1] sm:$0xff]  ;;  %v29_v11 = vld [vmem:[%s944_s1 + $0x38] sm:$0xff] }
   0x4   :  { %539 = vmatpush.msra.mxu3 %v28_v2  ;;  %162 = vmatpush.msra.mxu2 %v30_v3  ;;  %v24_v8 = vld [vmem:[%s944_s1 + $0x10] sm:$0xff]  ;;  %v14_v10 = vld [vmem:[%s945_s0] sm:$0xff]  ;;  %v23_v13 = vld [vmem:[%s944_s1 + $0x8] sm:$0xff]  ;;  %v210_v22 = vadd.s32 256, %v199_v21  ;;  %v728_v44 = vadd.s32 128, %v199_v21 }
   0x5   :  { %120 = vmatpush.msra.mxu1 %v32_v6  ;;  %80 = vmatpush.msra.mxu0 %v28_v2  ;;  %v20_v9 = vld [vmem:[%s945_s0 + $0x30] sm:$0xff]  ;;  %v26_v12 = vld [vmem:[%s944_s1 + $0x20] sm:$0xff]  ;;  %v21_v14 = vld [vmem:[%s945_s0 + $0x38] sm:$0xff] }
   0x6   :  { %540 = vmatpush.msra.mxu3 %v25_v4  ;;  %163 = vmatpush.msra.mxu2 %v27_v5  ;;  %v15_v15 = vld [vmem:[%s945_s0 + $0x8] sm:$0xff]  ;;  %v16_v16 = vld [vmem:[%s945_s0 + $0x10] sm:$0xff]  ;;  %v17_v17 = vld [vmem:[%s945_s0 + $0x18] sm:$0xff]  ;;  %vm211_vm1 = vcmp.ge.s32.totalorder %v210_v22, 320  ;;  %vm212_vm2 = vcmp.lt.s32.totalorder %v210_v22, 325  ;;  %vm202_vm4 = vcmp.lt.s32.totalorder %v728_v44, 160 }
   0x7   :  { %121 = vmatpush.msra.mxu1 %v29_v11  ;;  %81 = vmatpush.msra.mxu0 %v25_v4  ;;  %v18_v18 = vld [vmem:[%s945_s0 + $0x20] sm:$0xff]  ;;  %v19_v19 = vld [vmem:[%s945_s0 + $0x28] sm:$0xff]  ;;  %vm707_vm3 = vmand %vm211_vm1, %vm212_vm2 }
   0x8   :  { %541 = vmatpush.msra.mxu3 %v22_v7  ;;  %164 = vmatpush.msra.mxu2 %v24_v8  ;;  %v34_v23 = vld [vmem:[%s946_s2] sm:$0x7] }
   0x9   :  { %520 = vmatmul.msk.f32.vlgmr.msra.gmra.mxu3 %vm42_vm0, %v20_v9  ;;  %530 = vmatmul.msk.f32.vlgmr.msra.gmra.mxu2 %vm42_vm0, %v14_v10  ;;  %v705_v24 = vperm.slane %v34_v23, 0  ;;  %v38_v25 = vperm.slane %v34_v23, 2  ;;  %v723_v37 = vperm.slane %v34_v23, 1 }
   0xa   :  { %542 = vmatpush.msrb.mxu3 %v32_v6  ;;  %122 = vmatpush.msra.mxu1 %v26_v12 }
   0xb   :  { %82 = vmatpush.msra.mxu0 %v22_v7 }
   0xc   :  { %543 = vmatpush.msrb.mxu3 %v29_v11  ;;  %123 = vmatpush.msra.mxu1 %v23_v13 }
   0xd   :  { %522 = vmatmul.msk.f32.vlgmr.msra.gmra.mxu1 %vm42_vm0, %v14_v10  ;;  %514 = vmatmul.msk.f32.vlgmr.msra.gmra.mxu0 %vm42_vm0, %v14_v10 }
   0xe   :  { %544 = vmatpush.msrb.mxu3 %v26_v12 }
  0x10   :  { %545 = vmatpush.msrb.mxu3 %v23_v13 }
  0x11   :  { %521 = vmatmul.msk.f32.gmra.mxu3 %vm42_vm0, %v21_v14  ;;  %531 = vmatmul.msk.f32.gmra.mxu2 %vm42_vm0, %v15_v15 }
  0x12   :  { %546 = vmatpush.msra.mxu3 %v33_v1 }
  0x14   :  { %547 = vmatpush.msra.mxu3 %v30_v3  ;;  %v201_v3 = vadd.s32 128, %v728_v44 }
  0x15   :  { %523 = vmatmul.msk.f32.gmra.mxu1 %vm42_vm0, %v15_v15  ;;  %515 = vmatmul.msk.f32.gmra.mxu0 %vm42_vm0, %v15_v15 }
  0x16   :  { %548 = vmatpush.msra.mxu3 %v27_v5  ;;  %vm205_vm5 = vcmp.ge.s32.totalorder %v201_v3, 320  ;;  %vm207_vm6 = vcmp.lt.s32.totalorder %v201_v3, 325 }
  0x17   :  { %vm759_vm7 = vmand %vm205_vm5, %vm207_vm6 }
  0x18   :  { %549 = vmatpush.msra.mxu3 %v24_v8 }
  0x19   :  { %528 = vmatmul.msk.f32.vlgmr.msrb.gmra.mxu3 %vm42_vm0, %v20_v9  ;;  %532 = vmatmul.msk.f32.gmra.mxu2 %vm42_vm0, %v16_v16 }
  0x1d   :  { %524 = vmatmul.msk.f32.gmra.mxu1 %vm42_vm0, %v16_v16  ;;  %516 = vmatmul.msk.f32.gmra.mxu0 %vm42_vm0, %v16_v16 }
  0x21   :  { %529 = vmatmul.msk.f32.gmra.mxu3 %vm42_vm0, %v21_v14  ;;  %533 = vmatmul.msk.f32.gmra.mxu2 %vm42_vm0, %v17_v17 }
  0x25   :  { %525 = vmatmul.msk.f32.gmra.mxu1 %vm42_vm0, %v17_v17  ;;  %517 = vmatmul.msk.f32.gmra.mxu0 %vm42_vm0, %v17_v17 }
  0x29   :  { %534 = vmatmul.msk.f32.gmra.mxu2 %vm42_vm0, %v18_v18  ;;  %536 = vmatmul.msk.f32.vlgmr.msra.gmra.mxu3 %vm42_vm0, %v20_v9 }
  0x2d   :  { %526 = vmatmul.msk.f32.gmra.mxu1 %vm42_vm0, %v18_v18  ;;  %518 = vmatmul.msk.f32.gmra.mxu0 %vm42_vm0, %v18_v18 }
  0x31   :  { %535 = vmatmul.msk.f32.gmra.mxu2 %vm42_vm0, %v19_v19  ;;  %537 = vmatmul.msk.f32.gmra.mxu3 %vm42_vm0, %v21_v14 }
  0x35   :  { %527 = vmatmul.msk.f32.gmra.mxu1 %vm42_vm0, %v19_v19  ;;  %519 = vmatmul.msk.f32.gmra.mxu0 %vm42_vm0, %v19_v19 }
  0x8a   :  { %v125_v21 = vpop.f32.mrf.mxu1 }
  0x8b   :  { %v126_v23 = vadd.f32 %v125_v21, %v723_v37 }
  0x8c   :  { %v102_v26 = vpop.f32.mrf.mxu3  ;;  %v166_v27 = vpop.f32.mrf.mxu2 }
  0x8d   :  { %v103_v29 = vadd.f32 %v102_v26, %v705_v24  ;;  %v167_v30 = vadd.f32 %v166_v27, %v38_v25  ;;  %v270_v27 = vmul.f32 1.442695, %v126_v23 }
  0x8f   :  { %196 = vst [vmem:[%s947_s3 + $0x90] sm:$0xff] %v103_v29  ;;  %v214_v31 = vsel %vm707_vm3, %v167_v30, -inf }
  0x90   :  { %222 = vmax.xlane.f32.xlu0 %v214_v31 }
  0x94   :  { %v105_v32 = vpop.f32.mrf.mxu3  ;;  %v169_v33 = vpop.f32.mrf.mxu2 }
  0x95   :  { %v106_v34 = vadd.f32 %v105_v32, %v705_v24  ;;  %v170_v35 = vadd.f32 %v169_v33, %v38_v25 }
  0x97   :  { %197 = vst [vmem:[%s947_s3 + $0xa8] sm:$0xff] %v106_v34  ;;  %v215_v36 = vsel %vm707_vm3, %v170_v35, -inf }
  0x98   :  { %224 = vmax.xlane.f32.xlu0 %v215_v36 }
  0x9c   :  { %v143_v38 = vpop.f32.mrf.mxu3  ;;  %v172_v39 = vpop.f32.mrf.mxu2 }
  0x9d   :  { %v144_v40 = vadd.f32 %v143_v38, %v723_v37  ;;  %v173_v41 = vadd.f32 %v172_v39, %v38_v25 }
  0x9f   :  { %v294_v42 = vmul.f32 1.442695, %v144_v40  ;;  %v216_v43 = vsel %vm707_vm3, %v173_v41, -inf }
  0xa0   :  { %226 = vmax.xlane.f32.xlu1 %v216_v43 }
  0xa1   :  { %550 = vpow2.f32 %v294_v42 }
  0xa4   :  { %v146_v45 = vpop.f32.mrf.mxu3  ;;  %v175_v46 = vpop.f32.mrf.mxu2 }
  0xa5   :  { %v147_v47 = vadd.f32 %v146_v45, %v723_v37  ;;  %v176_v48 = vadd.f32 %v175_v46, %v38_v25 }
  0xa7   :  { %v551_v49 = vpop.eup %550  ;;  %v298_v50 = vmul.f32 1.442695, %v147_v47  ;;  %v217_v51 = vsel %vm707_vm3, %v176_v48, -inf }
  0xa8   :  { %v458_v52 = vsel %vm202_vm4, %v144_v40, %v551_v49  ;;  %228 = vmax.xlane.f32.xlu1 %v217_v51 }
  0xa9   :  { %506 = vst [vmem:[%s947_s3 + $0x98] sm:$0xff] %v458_v52  ;;  %552 = vpow2.f32 %v298_v50 }
  0xac   :  { %v178_v53 = vpop.f32.mrf.mxu2  ;;  %v184_v54 = vpop.f32.mrf.mxu3 }
  0xad   :  { %v179_v55 = vadd.f32 %v178_v53, %v38_v25  ;;  %v185_v56 = vadd.f32 %v184_v54, %v38_v25 }
  0xaf   :  { %v553_v57 = vpop.eup %552  ;;  %v218_v58 = vsel %vm707_vm3, %v179_v55, -inf  ;;  %v220_v59 = vsel %vm707_vm3, %v185_v56, -inf }
  0xb0   :  { %v460_v60 = vsel %vm202_vm4, %v147_v47, %v553_v57  ;;  %230 = vmax.xlane.f32.xlu2 %v218_v58  ;;  %234 = vmax.xlane.f32.xlu0 %v220_v59 }
  0xb1   :  { %508 = vst [vmem:[%s947_s3 + $0xb0] sm:$0xff] %v460_v60 }
  0xb4   :  { %v181_v61 = vpop.f32.mrf.mxu2  ;;  %v187_v62 = vpop.f32.mrf.mxu3 }
  0xb5   :  { %v748_v63 = vadd.f32 %v181_v61, %v38_v25  ;;  %v750_v0 = vadd.f32 %v187_v62, %v38_v25  ;;  %v128_v62 = vpop.f32.mrf.mxu1 }
  0xb7   :  { %v219_v1 = vsel %vm707_vm3, %v748_v63, -inf  ;;  %v221_v2 = vsel %vm707_vm3, %v750_v0, -inf }
  0xb8   :  { %232 = vmax.xlane.f32.xlu2 %v219_v1  ;;  %236 = vmax.xlane.f32.xlu1 %v221_v2 }
  0xbd   :  { %v131_v1 = vpop.f32.mrf.mxu1 }
  0xbe   :  { %v132_v2 = vadd.f32 %v131_v1, %v723_v37 }
  0xc5   :  { %v134_v28 = vpop.f32.mrf.mxu1 }
 0x103   :  { %v223_v5 = vpop.xlane.xlu0 %222 }
 0x104   :  { %v239_v6 = vsel %vm759_vm7, %v223_v5, 0.0  ;;  %v278_v5 = vmul.f32 1.442695, %v132_v2 }
 0x105   :  { %v255_v7 = vsub.f32 %v167_v30, %v239_v6  ;;  %v84_v6 = vpop.f32.mrf.mxu0 }
 0x107   :  { %v272_v8 = vmul.f32 1.442695, %v255_v7 }
 0x109   :  { %554 = vpow2.f32 %v272_v8  ;;  %v85_v8 = vadd.f32 %v84_v6, %v705_v24 }
 0x10b   :  { %v225_v9 = vpop.xlane.xlu0 %224  ;;  %190 = vst [vmem:[%s947_s3] sm:$0xff] %v85_v8 }
 0x10c   :  { %v241_v10 = vsel %vm759_vm7, %v225_v9, 0.0  ;;  %v135_v9 = vadd.f32 %v134_v28, %v723_v37 }
 0x10d   :  { %v257_v11 = vsub.f32 %v170_v35, %v241_v10 }
 0x10f   :  { %v767_v12 = vpop.eup %554  ;;  %v276_v13 = vmul.f32 1.442695, %v257_v11  ;;  %v282_v11 = vmul.f32 1.442695, %v135_v9 }
 0x110   :  { %v302_v14 = vsel %vm707_vm3, %v767_v12, 0.0 }
 0x111   :  { %556 = vpow2.f32 %v276_v13  ;;  %310 = vadd.xlane.f32.xlu2 %v302_v14  ;;  %v87_v13 = vpop.f32.mrf.mxu0 }
 0x113   :  { %v227_v15 = vpop.xlane.xlu1 %226 }
 0x114   :  { %v243_v16 = vsel %vm759_vm7, %v227_v15, 0.0  ;;  %v88_v15 = vadd.f32 %v87_v13, %v705_v24 }
 0x115   :  { %v259_v17 = vsub.f32 %v173_v41, %v243_v16 }
 0x116   :  { %191 = vst [vmem:[%s947_s3 + $0x18] sm:$0xff] %v88_v15 }
 0x117   :  { %v774_v18 = vpop.eup %556  ;;  %v280_v19 = vmul.f32 1.442695, %v259_v17  ;;  %v137_v17 = vpop.f32.mrf.mxu1 }
 0x118   :  { %v303_v20 = vsel %vm707_vm3, %v774_v18, 0.0 }
 0x119   :  { %558 = vpow2.f32 %v280_v19  ;;  %312 = vadd.xlane.f32.xlu0 %v303_v20  ;;  %v138_v19 = vadd.f32 %v137_v17, %v723_v37 }
 0x11a   :  { %560 = vpow2.f32 %v270_v27 }
 0x11b   :  { %v229_v22 = vpop.xlane.xlu1 %228 }
 0x11c   :  { %v245_v25 = vsel %vm759_vm7, %v229_v22, 0.0  ;;  %v286_v22 = vmul.f32 1.442695, %v138_v19 }
 0x11d   :  { %v261_v26 = vsub.f32 %v176_v48, %v245_v25 }
 0x11f   :  { %v782_v29 = vpop.eup %558  ;;  %v284_v30 = vmul.f32 1.442695, %v261_v26 }
 0x120   :  { %v304_v31 = vsel %vm707_vm3, %v782_v29, 0.0  ;;  %v561_v36 = vpop.eup %560 }
 0x121   :  { %562 = vpow2.f32 %v284_v30  ;;  %314 = vadd.xlane.f32.xlu1 %v304_v31  ;;  %v446_v40 = vsel %vm202_vm4, %v126_v23, %v561_v36  ;;  %v90_v23 = vpop.f32.mrf.mxu0  ;;  %v140_v31 = vpop.f32.mrf.mxu1 }
 0x122   :  { %494 = vst [vmem:[%s947_s3 + $0x8] sm:$0xff] %v446_v40  ;;  %v91_v25 = vadd.f32 %v90_v23, %v705_v24 }
 0x123   :  { %v231_v32 = vpop.xlane.xlu2 %230  ;;  %v235_v33 = vpop.xlane.xlu0 %234 }
 0x124   :  { %v247_v34 = vsel %vm759_vm7, %v231_v32, 0.0  ;;  %v251_v35 = vsel %vm759_vm7, %v235_v33, 0.0  ;;  %192 = vst [vmem:[%s947_s3 + $0x30] sm:$0xff] %v91_v25  ;;  %v141_v33 = vadd.f32 %v140_v31, %v723_v37 }
 0x125   :  { %v263_v38 = vsub.f32 %v179_v55, %v247_v34  ;;  %v267_v39 = vsub.f32 %v185_v56, %v251_v35 }
 0x127   :  { %v793_v41 = vpop.eup %562  ;;  %v288_v42 = vmul.f32 1.442695, %v263_v38  ;;  %v296_v43 = vmul.f32 1.442695, %v267_v39  ;;  %v290_v39 = vmul.f32 1.442695, %v141_v33 }
 0x128   :  { %v305_v45 = vsel %vm707_vm3, %v793_v41, 0.0 }
 0x129   :  { %564 = vpow2.f32 %v288_v42  ;;  %316 = vadd.xlane.f32.xlu2 %v305_v45 }
 0x12a   :  { %566 = vpow2.f32 %v296_v43  ;;  %v93_v43 = vpop.f32.mrf.mxu0 }
 0x12b   :  { %v233_v46 = vpop.xlane.xlu2 %232  ;;  %v237_v47 = vpop.xlane.xlu1 %236 }
 0x12c   :  { %v249_v48 = vsel %vm759_vm7, %v233_v46, 0.0  ;;  %v253_v49 = vsel %vm759_vm7, %v237_v47, 0.0  ;;  %v94_v46 = vadd.f32 %v93_v43, %v705_v24 }
 0x12d   :  { %v265_v50 = vsub.f32 %v748_v63, %v249_v48  ;;  %v269_v51 = vsub.f32 %v750_v0, %v253_v49  ;;  %v129_v63 = vadd.f32 %v128_v62, %v723_v37 }
 0x12e   :  { %193 = vst [vmem:[%s947_s3 + $0x48] sm:$0xff] %v94_v46 }
 0x12f   :  { %v807_v52 = vpop.eup %564  ;;  %v292_v53 = vmul.f32 1.442695, %v265_v50  ;;  %v300_v54 = vmul.f32 1.442695, %v269_v51  ;;  %v274_v0 = vmul.f32 1.442695, %v129_v63 }
 0x130   :  { %v809_v55 = vpop.eup %566  ;;  %v306_v56 = vsel %vm707_vm3, %v807_v52, 0.0 }
 0x131   :  { %568 = vpow2.f32 %v292_v53  ;;  %318 = vadd.xlane.f32.xlu0 %v306_v56  ;;  %v308_v57 = vsel %vm707_vm3, %v809_v55, 0.0 }
 0x132   :  { %570 = vpow2.f32 %v300_v54  ;;  %322 = vadd.xlane.f32.xlu2 %v308_v57 }
 0x133   :  { %572 = vpow2.f32 %v274_v0  ;;  %v96_v0 = vpop.f32.mrf.mxu0 }
 0x134   :  { %574 = vpow2.f32 %v278_v5 }
 0x135   :  { %576 = vpow2.f32 %v282_v11 }
 0x137   :  { %v817_v58 = vpop.eup %568 }
 0x138   :  { %v819_v59 = vpop.eup %570  ;;  %v307_v60 = vsel %vm707_vm3, %v817_v58, 0.0 }
 0x139   :  { %320 = vadd.xlane.f32.xlu1 %v307_v60  ;;  %v309_v61 = vsel %vm707_vm3, %v819_v59, 0.0  ;;  %v573_v3 = vpop.eup %572 }
 0x13a   :  { %324 = vadd.xlane.f32.xlu0 %v309_v61  ;;  %v448_v7 = vsel %vm202_vm4, %v129_v63, %v573_v3  ;;  %v575_v10 = vpop.eup %574 }
 0x13b   :  { %496 = vst [vmem:[%s947_s3 + $0x20] sm:$0xff] %v448_v7  ;;  %v450_v14 = vsel %vm202_vm4, %v132_v2, %v575_v10  ;;  %v577_v20 = vpop.eup %576  ;;  %v97_v2 = vadd.f32 %v96_v0, %v705_v24 }
 0x13c   :  { %498 = vst [vmem:[%s947_s3 + $0x38] sm:$0xff] %v450_v14  ;;  %v452_v21 = vsel %vm202_vm4, %v135_v9, %v577_v20  ;;  %v99_v14 = vpop.f32.mrf.mxu0 }
 0x13d   :  { %500 = vst [vmem:[%s947_s3 + $0x50] sm:$0xff] %v452_v21  ;;  %v100_v17 = vadd.f32 %v99_v14, %v705_v24 }
 0x13e   :  { %194 = vst [vmem:[%s947_s3 + $0x60] sm:$0xff] %v97_v2 }
 0x13f   :  { %195 = vst [vmem:[%s947_s3 + $0x78] sm:$0xff] %v100_v17 }
 0x184   :  { %v311_v16 = vpop.xlane.xlu2 %310 }
 0x185   :  { %578 = vrcp.f32 %v311_v16  ;;  %v337_v34 = vand.u32 2147483648, %v311_v16  ;;  %v335_v38 = vand.u32 2147483647, %v311_v16  ;;  %vm331_vm9 = vweird.f32 %v311_v16 }
 0x186   :  { %580 = vpow2.f32 %v286_v22 }
 0x187   :  { %v338_v37 = vor.u32 1.1754944e-38, %v337_v34  ;;  %vm336_vm11 = vcmp.eq.f32.partialorder %v335_v38, 8.507059e+37 }
 0x18b   :  { %v579_v26 = vpop.eup %578 }
 0x18c   :  { %v327_v27 = vmul.f32 %v579_v26, %v311_v16  ;;  %v313_v30 = vpop.xlane.xlu0 %312  ;;  %v581_v35 = vpop.eup %580  ;;  %vm332_vm8 = vweird.f32 %v579_v26 }
 0x18d   :  { %582 = vrcp.f32 %v313_v30  ;;  %v454_v40 = vsel %vm202_vm4, %v138_v19, %v581_v35  ;;  %vm333_vm10 = vmor %vm331_vm9, %vm332_vm8  ;;  %v352_v54 = vand.u32 2147483648, %v313_v30  ;;  %v350_v61 = vand.u32 2147483647, %v313_v30 }
 0x18e   :  { %v328_v32 = vsub.f32 1.0, %v327_v27  ;;  %502 = vst [vmem:[%s947_s3 + $0x68] sm:$0xff] %v454_v40  ;;  %584 = vpow2.f32 %v290_v39  ;;  %vm346_vm13 = vweird.f32 %v313_v30 }
 0x18f   :  { %vm351_vm15 = vcmp.eq.f32.partialorder %v350_v61, 8.507059e+37 }
 0x190   :  { %v329_v36 = vmul.f32 %v579_v26, %v328_v32 }
 0x192   :  { %v330_v42 = vadd.f32 %v579_v26, %v329_v36 }
 0x193   :  { %v583_v45 = vpop.eup %582 }
 0x194   :  { %v334_v47 = vsel %vm333_vm10, %v579_v26, %v330_v42  ;;  %v342_v48 = vmul.f32 %v583_v45, %v313_v30  ;;  %v315_v49 = vpop.xlane.xlu1 %314  ;;  %v585_v56 = vpop.eup %584  ;;  %vm347_vm12 = vweird.f32 %v583_v45 }
 0x195   :  { %v339_v50 = vsel %vm336_vm11, %v338_v37, %v334_v47  ;;  %586 = vrcp.f32 %v315_v49  ;;  %v456_v62 = vsel %vm202_vm4, %v141_v33, %v585_v56  ;;  %vm348_vm14 = vmor %vm346_vm13, %vm347_vm12  ;;  %v367_v28 = vand.u32 2147483648, %v315_v49 }
 0x196   :  { %v463_v51 = vmul.f32 %v767_v12, %v339_v50  ;;  %v343_v53 = vsub.f32 1.0, %v342_v48  ;;  %504 = vst [vmem:[%s947_s3 + $0x80] sm:$0xff] %v456_v62  ;;  %v365_v11 = vand.u32 2147483647, %v315_v49  ;;  %vm361_vm1 = vweird.f32 %v315_v49 }
 0x197   :  { %v368_v16 = vor.u32 1.1754944e-38, %v367_v28 }
 0x198   :  { %v479_v57 = vsel %vm759_vm7, %v463_v51, %v767_v12  ;;  %v344_v60 = vmul.f32 %v583_v45, %v343_v53  ;;  %v353_v12 = vor.u32 1.1754944e-38, %v352_v54  ;;  %vm366_vm3 = vcmp.eq.f32.partialorder %v365_v11, 8.507059e+37 }
 0x199   :  { %495 = vst [vmem:[%s947_s3 + $0x10] sm:$0xff] %v479_v57 }
 0x19a   :  { %v345_v63 = vadd.f32 %v583_v45, %v344_v60 }
 0x19b   :  { %v587_v1 = vpop.eup %586 }
 0x19c   :  { %v349_v3 = vsel %vm348_vm14, %v583_v45, %v345_v63  ;;  %v357_v5 = vmul.f32 %v587_v1, %v315_v49  ;;  %v317_v6 = vpop.xlane.xlu2 %316  ;;  %vm362_vm0 = vweird.f32 %v587_v1 }
 0x19d   :  { %v354_v7 = vsel %vm351_vm15, %v353_v12, %v349_v3  ;;  %588 = vrcp.f32 %v317_v6  ;;  %vm363_vm2 = vmor %vm361_vm1, %vm362_vm0  ;;  %v382_v26 = vand.u32 2147483648, %v317_v6  ;;  %v380_v30 = vand.u32 2147483647, %v317_v6 }
 0x19e   :  { %v465_v44 = vmul.f32 %v774_v18, %v354_v7  ;;  %v358_v8 = vsub.f32 1.0, %v357_v5  ;;  %vm376_vm5 = vweird.f32 %v317_v6 }
 0x19f   :  { %v383_v33 = vor.u32 1.1754944e-38, %v382_v26  ;;  %vm381_vm8 = vcmp.eq.f32.partialorder %v380_v30, 8.507059e+37 }
 0x1a0   :  { %v481_v9 = vsel %vm759_vm7, %v465_v44, %v774_v18  ;;  %v359_v10 = vmul.f32 %v587_v1, %v358_v8 }
 0x1a1   :  { %497 = vst [vmem:[%s947_s3 + $0x28] sm:$0xff] %v481_v9 }
 0x1a2   :  { %v360_v13 = vadd.f32 %v587_v1, %v359_v10 }
 0x1a3   :  { %v589_v15 = vpop.eup %588 }
 0x1a4   :  { %v364_v19 = vsel %vm363_vm2, %v587_v1, %v360_v13  ;;  %v372_v20 = vmul.f32 %v589_v15, %v317_v6  ;;  %v319_v21 = vpop.xlane.xlu0 %318  ;;  %vm377_vm4 = vweird.f32 %v589_v15 }
 0x1a5   :  { %v369_v18 = vsel %vm366_vm3, %v368_v16, %v364_v19  ;;  %v323_v22 = vpop.xlane.xlu2 %322  ;;  %590 = vrcp.f32 %v319_v21  ;;  %vm378_vm6 = vmor %vm376_vm5, %vm377_vm4  ;;  %v395_v37 = vand.u32 2147483647, %v319_v21  ;;  %v397_v46 = vand.u32 2147483648, %v319_v21 }
 0x1a6   :  { %v467_v23 = vmul.f32 %v782_v29, %v369_v18  ;;  %v373_v25 = vsub.f32 1.0, %v372_v20  ;;  %592 = vrcp.f32 %v323_v22  ;;  %v427_v48 = vand.u32 2147483648, %v323_v22 }
 0x1a7   :  { %v425_v51 = vand.u32 2147483647, %v323_v22  ;;  %vm391_vm11 = vweird.f32 %v319_v21  ;;  %vm421_vm12 = vweird.f32 %v323_v22  ;;  %v398_v57 = vor.u32 1.1754944e-38, %v397_v46 }
 0x1a8   :  { %v483_v24 = vsel %vm759_vm7, %v467_v23, %v782_v29  ;;  %v374_v27 = vmul.f32 %v589_v15, %v373_v25  ;;  %v428_v60 = vor.u32 1.1754944e-38, %v427_v48  ;;  %vm396_vm15 = vcmp.eq.f32.partialorder %v395_v37, 8.507059e+37 }
 0x1a9   :  { %499 = vst [vmem:[%s947_s3 + $0x40] sm:$0xff] %v483_v24  ;;  %vm426_vm0 = vcmp.eq.f32.partialorder %v425_v51, 8.507059e+37 }
 0x1aa   :  { %v375_v31 = vadd.f32 %v589_v15, %v374_v27 }
 0x1ab   :  { %v591_v32 = vpop.eup %590 }
 0x1ac   :  { %v593_v34 = vpop.eup %592  ;;  %v379_v35 = vsel %vm378_vm6, %v589_v15, %v375_v31  ;;  %v387_v36 = vmul.f32 %v591_v32, %v319_v21  ;;  %v321_v38 = vpop.xlane.xlu1 %320  ;;  %vm392_vm9 = vweird.f32 %v591_v32 }
 0x1ad   :  { %v384_v39 = vsel %vm381_vm8, %v383_v33, %v379_v35  ;;  %v417_v40 = vmul.f32 %v593_v34, %v323_v22  ;;  %594 = vrcp.f32 %v321_v38  ;;  %v902_v29 = vpop.xlane.xlu0 %324  ;;  %vm422_vm10 = vweird.f32 %v593_v34  ;;  %vm393_vm13 = vmor %vm391_vm11, %vm392_vm9 }
 0x1ae   :  { %v469_v42 = vmul.f32 %v793_v41, %v384_v39  ;;  %v388_v43 = vsub.f32 1.0, %v387_v36  ;;  %596 = vrcp.f32 %v902_v29  ;;  %vm423_vm14 = vmor %vm421_vm12, %vm422_vm10  ;;  %v410_v6 = vand.u32 2147483647, %v321_v38 }
 0x1af   :  { %v418_v45 = vsub.f32 1.0, %v417_v40  ;;  %v412_v7 = vand.u32 2147483648, %v321_v38  ;;  %vm406_vm2 = vweird.f32 %v321_v38  ;;  %v442_v10 = vand.u32 2147483648, %v902_v29 }
 0x1b0   :  { %v485_v47 = vsel %vm759_vm7, %v469_v42, %v793_v41  ;;  %v389_v49 = vmul.f32 %v591_v32, %v388_v43  ;;  %v440_v13 = vand.u32 2147483647, %v902_v29  ;;  %vm411_vm5 = vcmp.eq.f32.partialorder %v410_v6, 8.507059e+37 }
 0x1b1   :  { %501 = vst [vmem:[%s947_s3 + $0x58] sm:$0xff] %v485_v47  ;;  %v419_v50 = vmul.f32 %v593_v34, %v418_v45  ;;  %v413_v14 = vor.u32 1.1754944e-38, %v412_v7  ;;  %vm436_vm6 = vweird.f32 %v902_v29  ;;  %v443_v17 = vor.u32 1.1754944e-38, %v442_v10 }
 0x1b2   :  { %v390_v53 = vadd.f32 %v591_v32, %v389_v49  ;;  %vm441_vm9 = vcmp.eq.f32.partialorder %v440_v13, 8.507059e+37 }
 0x1b3   :  { %v595_v54 = vpop.eup %594  ;;  %v420_v56 = vadd.f32 %v593_v34, %v419_v50 }
 0x1b4   :  { %v394_v41 = vsel %vm393_vm13, %v591_v32, %v390_v53  ;;  %v402_v61 = vmul.f32 %v595_v54, %v321_v38  ;;  %v597_v62 = vpop.eup %596  ;;  %vm407_vm1 = vweird.f32 %v595_v54 }
 0x1b5   :  { %v424_v63 = vsel %vm423_vm14, %v593_v34, %v420_v56  ;;  %v399_v0 = vsel %vm396_vm15, %v398_v57, %v394_v41  ;;  %v432_v3 = vmul.f32 %v597_v62, %v902_v29  ;;  %vm437_vm3 = vweird.f32 %v597_v62  ;;  %vm408_vm4 = vmor %vm406_vm2, %vm407_vm1 }
 0x1b6   :  { %v429_v1 = vsel %vm426_vm0, %v428_v60, %v424_v63  ;;  %v471_v12 = vmul.f32 %v807_v52, %v399_v0  ;;  %v403_v2 = vsub.f32 1.0, %v402_v61  ;;  %vm438_vm8 = vmor %vm436_vm6, %vm437_vm3 }
 0x1b7   :  { %v475_v5 = vmul.f32 %v809_v55, %v429_v1  ;;  %v433_v28 = vsub.f32 1.0, %v432_v3 }
 0x1b8   :  { %v487_v44 = vsel %vm759_vm7, %v471_v12, %v807_v52  ;;  %v404_v8 = vmul.f32 %v595_v54, %v403_v2 }
 0x1b9   :  { %v491_v9 = vsel %vm759_vm7, %v475_v5, %v809_v55  ;;  %503 = vst [vmem:[%s947_s3 + $0x70] sm:$0xff] %v487_v44  ;;  %v434_v52 = vmul.f32 %v597_v62, %v433_v28 }
 0x1ba   :  { %507 = vst [vmem:[%s947_s3 + $0xa0] sm:$0xff] %v491_v9  ;;  %v405_v11 = vadd.f32 %v595_v54, %v404_v8 }
 0x1bb   :  { %v435_v55 = vadd.f32 %v597_v62, %v434_v52 }
 0x1bc   :  { %v409_v15 = vsel %vm408_vm4, %v595_v54, %v405_v11 }
 0x1bd   :  { %v414_v16 = vsel %vm411_vm5, %v413_v14, %v409_v15  ;;  %v439_v20 = vsel %vm438_vm8, %v597_v62, %v435_v55 }
 0x1be   :  { %v473_v19 = vmul.f32 %v817_v58, %v414_v16  ;;  %v444_v21 = vsel %vm441_vm9, %v443_v17, %v439_v20 }
 0x1bf   :  { %v477_v22 = vmul.f32 %v819_v59, %v444_v21 }
 0x1c0   :  { %v489_v18 = vsel %vm759_vm7, %v473_v19, %v817_v58 }
 0x1c1   :  { %505 = vst [vmem:[%s947_s3 + $0x88] sm:$0xff] %v489_v18  ;;  %v493_v23 = vsel %vm759_vm7, %v477_v22, %v819_v59 }
 0x1c2   :  { %509 = vst [vmem:[%s947_s3 + $0xb8] sm:$0xff] %v493_v23 }

</bundles_post_ra>
